<compile_context>
chip_gen: v7x
topology: tpu7x:2x2x1
jax: 0.10.0
libtpu: 0.0.40
codegen_flags: <defaults>
</compile_context>

<pallas_src>
import functools

import jax
import jax.numpy as jnp
from jax import lax
from jax.experimental import pallas as pl
from jax.experimental.pallas import tpu as pltpu

_LOGIT_SCALE_MAX = 4.6052
_NORM_EPS = 1e-12


def _encoder_kernel(scale_ref, x_ref, w_ref, xn_ref, acc_ref):
    """Tiled embs = x @ W; at last F step: L2-normalize rows, fold sqrt(scale)."""
    k = pl.program_id(1)

    @pl.when(k == 0)
    def _():
        acc_ref[...] = jnp.zeros_like(acc_ref)

    # bf16/f32 MXU matmul with f32 accumulation (no pre-cast to f32).
    acc_ref[...] += jnp.dot(x_ref[...], w_ref[...],
                            preferred_element_type=jnp.float32)

    @pl.when(k == pl.num_programs(1) - 1)
    def _():
        embs = acc_ref[...]                                    # (tb, D) f32
        sumsq = jnp.sum(embs * embs, axis=-1, keepdims=True)   # (tb, 1)
        scale = jnp.exp(jnp.clip(scale_ref[0], 0.0, _LOGIT_SCALE_MAX))
        # rsqrt -> EUP slot; folding sqrt(scale) removes the O(B^2) logit scale.
        inv = lax.rsqrt(sumsq + _NORM_EPS) * jnp.sqrt(scale)
        xn_ref[...] = (embs * inv).astype(xn_ref.dtype)


def _lse_loss_kernel(scale_ref, q_ref, k_ref, out_ref, m_sc, l_sc):
    """Flash-style row LSE of L = xn @ xn.T; emits per-row (lse - scale)."""
    j = pl.program_id(1)

    @pl.when(j == 0)
    def _():
        m_sc[...] = jnp.full_like(m_sc, -jnp.inf)
        l_sc[...] = jnp.zeros_like(l_sc)

    # NT contraction directly on the MXU: no transposed copy of xn.
    s = lax.dot_general(q_ref[...], k_ref[...],
                        dimension_numbers=(((1,), (1,)), ((), ())),
                        preferred_element_type=jnp.float32)     # (tq, tk)

    m_prev = m_sc[...]
    m_new = jnp.maximum(m_prev, jnp.max(s, axis=-1, keepdims=True))
    alpha = jnp.exp(m_prev - m_new)
    p = jnp.exp(s - m_new)
    l_sc[...] = alpha * l_sc[...] + jnp.sum(p, axis=-1, keepdims=True)
    m_sc[...] = m_new

    @pl.when(j == pl.num_programs(1) - 1)
    def _():
        # diag(L) == scale exactly (unit-norm rows * sqrt(scale) both sides),
        # so the per-row cross-entropy term is simply lse - scale.
        scale = jnp.exp(jnp.clip(scale_ref[0], 0.0, _LOGIT_SCALE_MAX))
        out_ref[...] = m_sc[...] + jnp.log(l_sc[...]) - scale


def _pick_tile(dim, preferred):
    # Use the preferred MXU-aligned tile when it divides the dim, else the
    # full dim (small shapes fall back to a single whole-array block).
    return preferred if dim % preferred == 0 else dim


@functools.partial(jax.jit,
                   static_argnames=("compute_dtype", "tb", "tf", "tq", "tk"))
def infonce_loss(x, w, logit_scale, *, compute_dtype=jnp.float32,
                 tb=128, tf=128, tq=128, tk=128):
    """x: (B,F) f32, w: (F,D) f32, logit_scale: (1,) f32 (log value)."""
    B, F = x.shape
    D = w.shape[1]

    tb = _pick_tile(B, tb)
    tf = _pick_tile(F, tf)
    tq = _pick_tile(B, tq)
    tk = _pick_tile(B, tk)

    xc = x.astype(compute_dtype)
    wc = w.astype(compute_dtype)
    itemsize = int(jnp.dtype(compute_dtype).itemsize)

    # ---- kernel 1: tiled encoder matmul + fused normalize / scale fold ----
    xn = pl.pallas_call(
        _encoder_kernel,
        out_shape=jax.ShapeDtypeStruct((B, D), compute_dtype),
        grid_spec=pltpu.PrefetchScalarGridSpec(
            num_scalar_prefetch=0,
            grid=(B // tb, F // tf),                 # F = reduction axis (last)
            in_specs=[
                pl.BlockSpec(memory_space=pltpu.MemorySpace.SMEM),  # logit_scale
                pl.BlockSpec((tb, tf), lambda i, k: (i, k)),        # x tile
                pl.BlockSpec((tf, D), lambda i, k: (k, 0)),         # W strip
            ],
            out_specs=pl.BlockSpec((tb, D), lambda i, k: (i, 0)),
            scratch_shapes=[pltpu.VMEM((tb, D), jnp.float32)],
        ),
        compiler_params=pltpu.CompilerParams(
            dimension_semantics=("parallel", "arbitrary")),
        cost_estimate=pl.CostEstimate(
            flops=int(2 * B * F * D),
            transcendentals=int(2 * B),
            bytes_accessed=int((B * F + F * D + B * D) * itemsize)),
    )(logit_scale, xc, wc)

    # ---- kernel 2: flash-style LSE of L = xn @ xn.T, per-row CE term ----
    row_ce = pl.pallas_call(
        _lse_loss_kernel,
        out_shape=jax.ShapeDtypeStruct((B, 1), jnp.float32),
        grid_spec=pltpu.PrefetchScalarGridSpec(
            num_scalar_prefetch=0,
            grid=(B // tq, B // tk),                 # k = reduction axis (last)
            in_specs=[
                pl.BlockSpec(memory_space=pltpu.MemorySpace.SMEM),  # logit_scale
                pl.BlockSpec((tq, D), lambda i, j: (i, 0)),         # xn q-tile
                pl.BlockSpec((tk, D), lambda i, j: (j, 0)),         # xn k-tile
            ],
            out_specs=pl.BlockSpec((tq, 1), lambda i, j: (i, 0)),
            scratch_shapes=[pltpu.VMEM((tq, 1), jnp.float32),       # running max
                            pltpu.VMEM((tq, 1), jnp.float32)],      # running sum-exp
        ),
        compiler_params=pltpu.CompilerParams(
            dimension_semantics=("parallel", "arbitrary")),
        cost_estimate=pl.CostEstimate(
            flops=int(2 * B * B * D),
            transcendentals=int(B * B),
            bytes_accessed=int((B * D + (B // tq) * B * D) * itemsize + B * 4)),
    )(logit_scale, xn, xn)

    # CE(L) == CE(L.T) because L is exactly symmetric -> the /2 average is a no-op.
    return jnp.mean(row_ce)


def infonce_loss_ref(x, w, logit_scale):
    """Pure-JAX reference mirroring the PyTorch module literally."""
    embs = x @ w
    scale = jnp.exp(jnp.clip(logit_scale[0], 0.0, _LOGIT_SCALE_MAX))
    xn = embs / jnp.linalg.norm(embs, axis=-1, keepdims=True)
    logits = scale * (xn @ xn.T)
    labels = jnp.arange(logits.shape[0])

    def ce(lg):
        lse = jax.scipy.special.logsumexp(lg, axis=-1)
        return jnp.mean(lse - lg[jnp.arange(lg.shape[0]), labels])

    return 0.5 * (ce(logits) + ce(logits.T))


if __name__ == "__main__":
    # Small but tiled: B=256 samples, F=256 input features, D=128 embed dim
    # -> encoder grid (2, 2) and loss grid (2, 2) with 128x128 MXU-aligned tiles.
    B, F, D = 256, 256, 128
    key = jax.random.PRNGKey(0)
    kx, kw = jax.random.split(key)

    # deterministic synthetic inputs + encoder weight (the "model")
    x = jax.random.normal(kx, (B, F), dtype=jnp.float32)
    w = 0.1 * jax.random.normal(kw, (F, D), dtype=jnp.float32)

    # nn.Parameter(log(1 / logit_scale_init_value)), CLIP-style init value
    logit_scale_init_value = 0.07
    logit_scale = jnp.log(
        jnp.array([1.0 / logit_scale_init_value], dtype=jnp.float32))

    ref = infonce_loss_ref(x, w, logit_scale)

    # f32 path: tight tolerance against the literal reference.
    loss_f32 = infonce_loss(x, w, logit_scale, compute_dtype=jnp.float32)
    jax.block_until_ready(loss_f32)
    assert jnp.allclose(loss_f32, ref, rtol=1e-4, atol=3e-5), (loss_f32, ref)

    # bf16 MXU-input path (halves HBM/VMEM traffic for the big operands,
    # ~2x MXU throughput on v6e/v7x); normalization/softmax stay in f32,
    # so only matmul rounding differs from the f32 reference.
    loss_bf16 = infonce_loss(x, w, logit_scale, compute_dtype=jnp.bfloat16)
    jax.block_until_ready(loss_bf16)
    assert jnp.allclose(loss_bf16, ref, rtol=5e-2, atol=5e-2), (loss_bf16, ref)

    print("KERNEL_OK")
</pallas_src>

<mosaic_0001>
module attributes {stable_mosaic.version = 11 : i64} {
  func.func @_encoder_kernel(%arg0: i32, %arg1: i32, %arg2: memref<1xf32, #tpu.memory_space<smem>>, %arg3: memref<128x128xf32, #tpu.memory_space<vmem>>, %arg4: memref<128x128xf32, #tpu.memory_space<vmem>>, %arg5: memref<128x128xf32, #tpu.memory_space<vmem>>, %arg6: memref<128x128xf32, #tpu.memory_space<vmem>>) attributes {dimension_semantics = [#tpu.dimension_semantics<parallel>, #tpu.dimension_semantics<arbitrary>], iteration_bounds = array<i64: 2, 2>, scalar_prefetch = 0 : i64, scratch_operands = 1 : i64, tpu.core_type = #tpu.core_type<tc>, window_params = [{transform_indices = @transform_0, window_bounds = array<i64: 1>}, {transform_indices = @transform_1, window_bounds = array<i64: 128, 128>}, {transform_indices = @transform_2, window_bounds = array<i64: 128, 128>}, {transform_indices = @transform_3, window_bounds = array<i64: 128, 128>}]} {
    %c0_i32 = arith.constant 0 : i32
    %0 = arith.cmpi eq, %arg1, %c0_i32 : i32
    %1 = arith.extui %0 : i1 to i32
    %c0_i32_0 = arith.constant 0 : i32
    %2 = arith.cmpi ne, %1, %c0_i32_0 : i32
    scf.if %2 {
      %cst_9 = arith.constant 0.000000e+00 : f32
      %12 = vector.broadcast %cst_9 : f32 to vector<128x128xf32>
      %c0_10 = arith.constant 0 : index
      %c0_11 = arith.constant 0 : index
      %13 = vector.load %arg6[%c0_10, %c0_11] : memref<128x128xf32, #tpu.memory_space<vmem>>, vector<128x128xf32>
      tpu.vector_store %arg6[%c0_10, %c0_11], %12 {strides = array<i32>} : memref<128x128xf32, #tpu.memory_space<vmem>>, vector<128x128xf32>,
    } else {
    }
    %c0 = arith.constant 0 : index
    %c0_1 = arith.constant 0 : index
    %3 = vector.load %arg6[%c0, %c0_1] : memref<128x128xf32, #tpu.memory_space<vmem>>, vector<128x128xf32>
    %c0_2 = arith.constant 0 : index
    %c0_3 = arith.constant 0 : index
    %4 = vector.load %arg3[%c0_2, %c0_3] : memref<128x128xf32, #tpu.memory_space<vmem>>, vector<128x128xf32>
    %c0_4 = arith.constant 0 : index
    %c0_5 = arith.constant 0 : index
    %5 = vector.load %arg4[%c0_4, %c0_5] : memref<128x128xf32, #tpu.memory_space<vmem>>, vector<128x128xf32>
    %cst = arith.constant dense<0.000000e+00> : vector<128x128xf32>
    %6 = tpu.matmul %4, %5, %cst {dimension_numbers = #tpu.dot_dimension_numbers<[1], [0], [0], [1], [0, 0, 1, 1], [], []>} : vector<128x128xf32>, vector<128x128xf32>, vector<128x128xf32> -> vector<128x128xf32>
    %7 = arith.addf %3, %6 : vector<128x128xf32>
    %c0_6 = arith.constant 0 : index
    %c0_7 = arith.constant 0 : index
    %8 = vector.load %arg6[%c0_6, %c0_7] : memref<128x128xf32, #tpu.memory_space<vmem>>, vector<128x128xf32>
    tpu.vector_store %arg6[%c0_6, %c0_7], %7 {strides = array<i32>} : memref<128x128xf32, #tpu.memory_space<vmem>>, vector<128x128xf32>,
    %c1_i32 = arith.constant 1 : i32
    %9 = arith.cmpi eq, %arg1, %c1_i32 : i32
    %10 = arith.extui %9 : i1 to i32
    %c0_i32_8 = arith.constant 0 : i32
    %11 = arith.cmpi ne, %10, %c0_i32_8 : i32
    scf.if %11 {
      %c0_9 = arith.constant 0 : index
      %c0_10 = arith.constant 0 : index
      %12 = vector.load %arg6[%c0_9, %c0_10] : memref<128x128xf32, #tpu.memory_space<vmem>>, vector<128x128xf32>
      %13 = arith.mulf %12, %12 : vector<128x128xf32>
      %cst_11 = arith.constant dense<0.000000e+00> : vector<128xf32>
      %14 = vector.multi_reduction <add>, %13, %cst_11 [1] : vector<128x128xf32> to vector<128xf32>
      %15 = vector.shape_cast %14 : vector<128xf32> to vector<128x1xf32>
      %c0_12 = arith.constant 0 : index
      %16 = memref.load %arg2[%c0_12] : memref<1xf32, #tpu.memory_space<smem>>
      %cst_13 = arith.constant 0.000000e+00 : f32
      %cst_14 = arith.constant 4.605200e+00 : f32
      %17 = arith.maximumf %cst_13, %16 : f32
      %18 = arith.minimumf %cst_14, %17 : f32
      %19 = math.exp %18 : f32
      %cst_15 = arith.constant 9.99999996E-13 : f32
      %20 = vector.broadcast %cst_15 : f32 to vector<128x1xf32>
      %21 = arith.addf %15, %20 : vector<128x1xf32>
      %22 = math.rsqrt %21 : vector<128x1xf32>
      %23 = math.sqrt %19 : f32
      %24 = vector.broadcast %23 : f32 to vector<128x1xf32>
      %25 = arith.mulf %22, %24 : vector<128x1xf32>
      %26 = vector.broadcast %25 : vector<128x1xf32> to vector<128x128xf32>
      %27 = arith.mulf %12, %26 : vector<128x128xf32>
      %c0_16 = arith.constant 0 : index
      %c0_17 = arith.constant 0 : index
      %28 = vector.load %arg5[%c0_16, %c0_17] : memref<128x128xf32, #tpu.memory_space<vmem>>, vector<128x128xf32>
      tpu.vector_store %arg5[%c0_16, %c0_17], %27 {strides = array<i32>} : memref<128x128xf32, #tpu.memory_space<vmem>>, vector<128x128xf32>,
    } else {
    }
    return
  }
  func.func @transform_0(%arg0: i32, %arg1: i32) -> i32 {
    %c0_i32 = arith.constant 0 : i32
    %c0_i32_0 = arith.constant 0 : i32
    return %c0_i32 : i32
  }
  func.func @transform_1(%arg0: i32, %arg1: i32) -> (i32, i32) {
    %c0_i32 = arith.constant 0 : i32
    return %arg0, %arg1 : i32, i32
  }
  func.func @transform_2(%arg0: i32, %arg1: i32) -> (i32, i32) {
    %c0_i32 = arith.constant 0 : i32
    %c0_i32_0 = arith.constant 0 : i32
    return %arg1, %c0_i32 : i32, i32
  }
  func.func @transform_3(%arg0: i32, %arg1: i32) -> (i32, i32) {
    %c0_i32 = arith.constant 0 : i32
    %c0_i32_0 = arith.constant 0 : i32
    return %arg0, %c0_i32 : i32, i32
  }
}

module attributes {stable_mosaic.version = 11 : i64} {
  func.func @_lse_loss_kernel(%arg0: i32, %arg1: i32, %arg2: memref<1xf32, #tpu.memory_space<smem>>, %arg3: memref<128x128xf32, #tpu.memory_space<vmem>>, %arg4: memref<128x128xf32, #tpu.memory_space<vmem>>, %arg5: memref<128x1xf32, #tpu.memory_space<vmem>>, %arg6: memref<128x1xf32, #tpu.memory_space<vmem>>, %arg7: memref<128x1xf32, #tpu.memory_space<vmem>>) attributes {dimension_semantics = [#tpu.dimension_semantics<parallel>, #tpu.dimension_semantics<arbitrary>], iteration_bounds = array<i64: 2, 2>, scalar_prefetch = 0 : i64, scratch_operands = 2 : i64, tpu.core_type = #tpu.core_type<tc>, window_params = [{transform_indices = @transform_0, window_bounds = array<i64: 1>}, {transform_indices = @transform_1, window_bounds = array<i64: 128, 128>}, {transform_indices = @transform_2, window_bounds = array<i64: 128, 128>}, {transform_indices = @transform_3, window_bounds = array<i64: 128, 1>}]} {
    %c0_i32 = arith.constant 0 : i32
    %0 = arith.cmpi eq, %arg1, %c0_i32 : i32
    %1 = arith.extui %0 : i1 to i32
    %c0_i32_0 = arith.constant 0 : i32
    %2 = arith.cmpi ne, %1, %c0_i32_0 : i32
    scf.if %2 {
      %cst_15 = arith.constant 0xFF800000 : f32
      %25 = vector.broadcast %cst_15 : f32 to vector<128x1xf32>
      %c0_16 = arith.constant 0 : index
      %c0_17 = arith.constant 0 : index
      %26 = vector.load %arg6[%c0_16, %c0_17] : memref<128x1xf32, #tpu.memory_space<vmem>>, vector<128x1xf32>
      tpu.vector_store %arg6[%c0_16, %c0_17], %25 {strides = array<i32>} : memref<128x1xf32, #tpu.memory_space<vmem>>, vector<128x1xf32>,
      %cst_18 = arith.constant 0.000000e+00 : f32
      %27 = vector.broadcast %cst_18 : f32 to vector<128x1xf32>
      %c0_19 = arith.constant 0 : index
      %c0_20 = arith.constant 0 : index
      %28 = vector.load %arg7[%c0_19, %c0_20] : memref<128x1xf32, #tpu.memory_space<vmem>>, vector<128x1xf32>
      tpu.vector_store %arg7[%c0_19, %c0_20], %27 {strides = array<i32>} : memref<128x1xf32, #tpu.memory_space<vmem>>, vector<128x1xf32>,
    } else {
    }
    %c0 = arith.constant 0 : index
    %c0_1 = arith.constant 0 : index
    %3 = vector.load %arg3[%c0, %c0_1] : memref<128x128xf32, #tpu.memory_space<vmem>>, vector<128x128xf32>
    %c0_2 = arith.constant 0 : index
    %c0_3 = arith.constant 0 : index
    %4 = vector.load %arg4[%c0_2, %c0_3] : memref<128x128xf32, #tpu.memory_space<vmem>>, vector<128x128xf32>
    %cst = arith.constant dense<0.000000e+00> : vector<128x128xf32>
    %5 = tpu.matmul %3, %4, %cst {dimension_numbers = #tpu.dot_dimension_numbers<[1], [1], [0], [0], [0, 0, 1, 0], [], []>} : vector<128x128xf32>, vector<128x128xf32>, vector<128x128xf32> -> vector<128x128xf32>
    %c0_4 = arith.constant 0 : index
    %c0_5 = arith.constant 0 : index
    %6 = vector.load %arg6[%c0_4, %c0_5] : memref<128x1xf32, #tpu.memory_space<vmem>>, vector<128x1xf32>
    %cst_6 = arith.constant dense<0xFF800000> : vector<128xf32>
    %7 = vector.multi_reduction <maximumf>, %5, %cst_6 [1] : vector<128x128xf32> to vector<128xf32>
    %8 = vector.shape_cast %7 : vector<128xf32> to vector<128x1xf32>
    %9 = arith.maximumf %6, %8 : vector<128x1xf32>
    %10 = arith.subf %6, %9 : vector<128x1xf32>
    %11 = math.exp %10 : vector<128x1xf32>
    %12 = vector.broadcast %9 : vector<128x1xf32> to vector<128x128xf32>
    %13 = arith.subf %5, %12 : vector<128x128xf32>
    %14 = math.exp %13 : vector<128x128xf32>
    %c0_7 = arith.constant 0 : index
    %c0_8 = arith.constant 0 : index
    %15 = vector.load %arg7[%c0_7, %c0_8] : memref<128x1xf32, #tpu.memory_space<vmem>>, vector<128x1xf32>
    %16 = arith.mulf %11, %15 : vector<128x1xf32>
    %cst_9 = arith.constant dense<0.000000e+00> : vector<128xf32>
    %17 = vector.multi_reduction <add>, %14, %cst_9 [1] : vector<128x128xf32> to vector<128xf32>
    %18 = vector.shape_cast %17 : vector<128xf32> to vector<128x1xf32>
    %19 = arith.addf %16, %18 : vector<128x1xf32>
    %c0_10 = arith.constant 0 : index
    %c0_11 = arith.constant 0 : index
    %20 = vector.load %arg7[%c0_10, %c0_11] : memref<128x1xf32, #tpu.memory_space<vmem>>, vector<128x1xf32>
    tpu.vector_store %arg7[%c0_10, %c0_11], %19 {strides = array<i32>} : memref<128x1xf32, #tpu.memory_space<vmem>>, vector<128x1xf32>,
    %c0_12 = arith.constant 0 : index
    %c0_13 = arith.constant 0 : index
    %21 = vector.load %arg6[%c0_12, %c0_13] : memref<128x1xf32, #tpu.memory_space<vmem>>, vector<128x1xf32>
    tpu.vector_store %arg6[%c0_12, %c0_13], %9 {strides = array<i32>} : memref<128x1xf32, #tpu.memory_space<vmem>>, vector<128x1xf32>,
    %c1_i32 = arith.constant 1 : i32
    %22 = arith.cmpi eq, %arg1, %c1_i32 : i32
    %23 = arith.extui %22 : i1 to i32
    %c0_i32_14 = arith.constant 0 : i32
    %24 = arith.cmpi ne, %23, %c0_i32_14 : i32
    scf.if %24 {
      %c0_15 = arith.constant 0 : index
      %25 = memref.load %arg2[%c0_15] : memref<1xf32, #tpu.memory_space<smem>>
      %cst_16 = arith.constant 0.000000e+00 : f32
      %cst_17 = arith.constant 4.605200e+00 : f32
      %26 = arith.maximumf %cst_16, %25 : f32
      %27 = arith.minimumf %cst_17, %26 : f32
      %28 = math.exp %27 : f32
      %c0_18 = arith.constant 0 : index
      %c0_19 = arith.constant 0 : index
      %29 = vector.load %arg6[%c0_18, %c0_19] : memref<128x1xf32, #tpu.memory_space<vmem>>, vector<128x1xf32>
      %c0_20 = arith.constant 0 : index
      %c0_21 = arith.constant 0 : index
      %30 = vector.load %arg7[%c0_20, %c0_21] : memref<128x1xf32, #tpu.memory_space<vmem>>, vector<128x1xf32>
      %31 = math.log %30 : vector<128x1xf32>
      %32 = arith.addf %29, %31 : vector<128x1xf32>
      %33 = vector.broadcast %28 : f32 to vector<128x1xf32>
      %34 = arith.subf %32, %33 : vector<128x1xf32>
      %c0_22 = arith.constant 0 : index
      %c0_23 = arith.constant 0 : index
      %35 = vector.load %arg5[%c0_22, %c0_23] : memref<128x1xf32, #tpu.memory_space<vmem>>, vector<128x1xf32>
      tpu.vector_store %arg5[%c0_22, %c0_23], %34 {strides = array<i32>} : memref<128x1xf32, #tpu.memory_space<vmem>>, vector<128x1xf32>,
    } else {
    }
    return
  }
  func.func @transform_0(%arg0: i32, %arg1: i32) -> i32 {
    %c0_i32 = arith.constant 0 : i32
    %c0_i32_0 = arith.constant 0 : i32
    return %c0_i32 : i32
  }
  func.func @transform_1(%arg0: i32, %arg1: i32) -> (i32, i32) {
    %c0_i32 = arith.constant 0 : i32
    %c0_i32_0 = arith.constant 0 : i32
    return %arg0, %c0_i32 : i32, i32
  }
  func.func @transform_2(%arg0: i32, %arg1: i32) -> (i32, i32) {
    %c0_i32 = arith.constant 0 : i32
    %c0_i32_0 = arith.constant 0 : i32
    return %arg1, %c0_i32 : i32, i32
  }
  func.func @transform_3(%arg0: i32, %arg1: i32) -> (i32, i32) {
    %c0_i32 = arith.constant 0 : i32
    %c0_i32_0 = arith.constant 0 : i32
    return %arg0, %c0_i32 : i32, i32
  }
}

</mosaic_0001>

<bundles_post_ra>
// kernel: infonce_loss.2
= control target key start
LH: loop header
LB: loop body
LE: loop exit
PB: predicated region body
PF: predicated region fallthrough
CT: control target
= control target key end

     0   :  { %s1671_s0 = inlined_call_operand.<no memory space> [shape: f32[1], index: 0, kind: input, shape index: {}]   ;;  %s1672_s1 = inlined_call_operand.hbm [shape: f32[256,256], index: 1, kind: input, shape index: {}]   ;;  %s1673_s2 = inlined_call_operand.hbm [shape: f32[256,128], index: 2, kind: input, shape index: {}]   ;;  %s1674_s3 = inlined_call_operand.vmem [shape: f32[256,128], index: 3, kind: output, shape index: {}]  }
   0x1   :  { %8 = sst [smem:[#allocation3]] %s1671_s0 }
   0x2   :  { %9 = vsyncpa [#allocation5], 0 }
   0x3   :  { %11 = vsyncpa [#allocation5 + $0x1], 0 }
   0x4   :  { %12 = vsyncpa [#allocation7], 0 }
   0x5   :  { %14 = vsyncpa [#allocation7 + $0x1], 0  ;;  %s1256_s14 = smov 0   ;;  %s1258_s15 = smov 0  }
   0x6   :  { %s1260_s16 = smov 0   ;;  %s1262_s17 = smov 0  }
   0x7   :  { %s1264_s18 = smov 0   ;;  %s1266_s19 = smov 0  }
   0x8   :  { %s1268_s20 = smov 0   ;;  %s1270_s21 = smov 0  }
   0x9   :  { %s1272_s0 = smov 0   ;;  %s1274_s22 = smov 0  }
   0xa   :  { %s1276_s23 = smov 0  }
   0xb LB: > { %s29_s24 = sadd.s32 1, %s1215_s0  ;;  %s32_s25 = sadd.s32 1, %s1219_s22  ;;  %s1223_s23 = sphi %s1276_s23, %s20_s23   ;;  %s1219_s22 = sphi %s1274_s22, %s1703_s22   ;;  %s1215_s0 = sphi %s1272_s0, %s1702_s0   ;;  %s1211_s21 = sphi %s1270_s21, %s1701_s21   ;;  %s1207_s20 = sphi %s1268_s20, %s1700_s20   ;;  %s1203_s19 = sphi %s1266_s19, %s1699_s19   ;;  %s1199_s18 = sphi %s1264_s18, %s1698_s18   ;;  %s1195_s17 = sphi %s1262_s17, %s1697_s17   ;;  %s1191_s16 = sphi %s1260_s16, %s1696_s16   ;;  %s1187_s15 = sphi %s1258_s15, %s1695_s15   ;;  %s1183_s14 = sphi %s1256_s14, %s1694_s14  }
   0xc   : > { %p30_p0 = scmp.ge.s32.totalorder %s29_s24, 2  ;;  %s62_s26 = sadd.s32 1, %s1203_s19 }
   0xd   : > { %p69_p1 = scmp.ne.s32.totalorder %s1203_s19, %s1199_s18  ;;  %p1677_p2 = scmp.eq.s32.totalorder %s1223_s23, 0 }
   0xe   : > { %s1705_s24 = smov (%p30_p0, %s29_s24), 0  ;;  %s1707_s25 = smov (!%p30_p0, %s32_s25), %s1219_s22 }
   0xf   : > { %s1322_s27 = ssub.s32 %s1215_s0, %s1705_s24  ;;  %p1326_p3 = por %p1677_p2, %p69_p1 }
  0x10   : > { %p34_p4 = scmp.ge.s32.totalorder %s1707_s25, 2  ;;  %p1676_p7 = scmp.lt.s32.totalorder %s1223_s23, 4 }
  0x11   : > { %s154_s29 = sand.u32 1, %s1203_s19   ;;  %s785_s6 = sshll.u32 %s1219_s22, 5 }
  0x12   : > { %s1709_s25 = smov (%p34_p4, %s1707_s25), 0  ;;  %s769_s5 = sshll.u32 %s154_s29, 7 }
  0x13   : > { %1681 = sst [smem:[#allocation10_spill]] %s1709_s25  ;;  %s57_s30 = ssub.s32 %s1219_s22, %s1709_s25 }
  0x14   : > { %s59_s4 = sor.u32 %s1322_s27, %s57_s30  ;;  %s158_s7 = scalar_lea.vmem [#allocation4], %s769_s5 }
  0x15   : > { %p60_p8 = scmp.eq.s32.totalorder %s59_s4, 0  ;;  %s167_s8 = sshll.u32 %s158_s7, 4  ;;  %s1345_s8 = int_to_ptr.vmem [resolvable:$true] %s167_s8 }
  0x16   : > { %s164_s10 = sadd.s32 %s1215_s0, %s785_s6  ;;  %p1351_p9 = pnand %p1676_p7, %p1326_p3 }
  0x17   : > { %s1342_s9 = scalar_select %p60_p8, %s1203_s19, %s62_s26  }
  0x18   : > { %s772_s11 = sshll.u32 %s164_s10, 7  ;;  %p776_p10 = scmp.ge.s32.totalorder %s1223_s23, 1 }
  0x19   : > { %s1358_s30 = scalar_lea.hbm %s1672_s1, %s772_s11  ;;  %s1361_s26 = scalar_lea.sflag [#allocation5], %s154_s29 }
  0x1a   : > { %s1069_s28 = scalar_lea.hbm %s1358_s30, 2048  ;;  %p1071_p12 = pneg %p1351_p9 }
  0x1b   : > { %p1070_p11 = scmp.ne.s32.totalorder %s1358_s30, %s1069_s28  ;;  %s1074_s5 = scalar_lea.hbm %s1672_s1, 8192 }
  0x1c   : > { %p1075_p1 = scmp.lt.u32.totalorder %s1358_s30, %s1672_s1  ;;  %p1076_p3 = scmp.lt.u32.totalorder %s1074_s5, %s1069_s28 }
  0x1d   : > { %p1072_p13 = pnand %p1071_p12, %p1070_p11  ;;  %p1078_p8 = scmp.lt.u32.totalorder %s1069_s28, %s1358_s30 }
  0x1e   : > { %p1077_p4 = por %p1076_p3, %p1075_p1 }
  0x1f   : > { %p1073_p0 = pneg %p1072_p13 }
  0x20   : > { %p1079_p7 = por %p1078_p8, %p1077_p4 }
  0x22   : > { %p1080_p2 = pnand %p1079_p7, %p1073_p0 }
  0x24   : > { %1083 = shalt.err (!%p1080_p2)
}
  0x25   : > { %s1084_s29 = scalar_lea.vmem %s1345_s8, 2048  ;;  %s1225_s10 = smov [#allocation4]  }
  0x26   : > { %p1085_p11 = scmp.ne.s32.totalorder %s1345_s8, %s1084_s29  ;;  %s1089_s11 = sshll.u32 %s1225_s10, 4  ;;  %s1090_s11 = int_to_ptr.vmem [resolvable:$false] %s1089_s11 }
  0x27   : > { %s1091_s13 = scalar_lea.vmem %s1090_s11, 4096  ;;  %p1092_p6 = scmp.lt.s32.totalorder %s1345_s8, %s1090_s11 }
  0x28   : > { %p1087_p13 = pnand %p1085_p11, %p1071_p12  ;;  %p1093_p1 = scmp.lt.s32.totalorder %s1091_s13, %s1084_s29 }
  0x2a   : > { %p1088_p5 = pneg %p1087_p13  ;;  %p1094_p3 = por %p1093_p1, %p1092_p6 }
  0x2c   : > { %p1095_p4 = pnand %p1094_p3, %p1088_p5 }
  0x2e   : > { %1098 = shalt.err (!%p1095_p4)
}
  0x2f   : > { %s1226_s28 = smov 256   ;;  %s1227_s25 = smov 128  }
  0x30   : > { %s1228_s4 = smov 8   ;;  %p196_p2 = scmp.lt.s32.totalorder %s1223_s23, 5 }
  0x31   : > { %934 = dma.hbm_to_vmem [thread:$0]  (!%p1351_p9), %s1358_s30, 2048, %s1345_s8, %s1361_s26, %s1226_s28, %s1227_s25, %s1228_s4  }
  0x32   : > { %p1394_p5 = pnand %p776_p10, %p196_p2  ;;  %s765_s6 = sadd.s32 4294967295, %s1223_s23  }
  0x33   : > { %s88_s7 = sadd.s32 1, %s1191_s16  ;;  %p76_p6 = scmp.eq.s32.totalorder %s765_s6, 0 }
  0x34   : > { %p95_p7 = scmp.ne.s32.totalorder %s1191_s16, %s1187_s15  ;;  %p1684_p12 = scmp.eq.s32.totalorder %s1322_s27, 0 }
  0x35   : > { %p1685_p0 = scmp.ne.s32.totalorder %s1199_s18, %s1195_s17  ;;  %p101_p9 = scmp.ne.s32.totalorder %s1187_s15, %s1183_s14 }
  0x36   : > { %s1405_s29 = scalar_select %p1684_p12, %s1191_s16, %s88_s7  }
  0x37   : > { %p1410_p8 = por %p76_p6, %p1685_p0  ;;  %s177_s8 = sand.u32 1, %s1191_s16  }
  0x38   : > { %p1687_p11 = scmp.eq.s32.totalorder %s1223_s23, 0  ;;  %s773_s30 = sshll.u32 %s177_s8, 7 }
  0x39   : > { %s1686_s12 = scalar_select %p1410_p8, 1, 0 }
  0x3a   : > { %p97_p10 = por %p95_p7, %p1687_p11  ;;  %p1419_p13 = por %p101_p9, %p76_p6 }
  0x3b   : > { %s786_s10 = sshll.u32 %s1215_s0, 11  ;;  %s181_s11 = scalar_lea.vmem [#allocation6], %s773_s30 }
  0x3c   : > { %s1688_s26 = scalar_select %p1419_p13, 1, 0 }
  0x3d   : > { %s188_s13 = sshll.u32 %s181_s11, 4  ;;  %s1427_s17 = scalar_lea.hbm %s1673_s2, %s786_s10  ;;  %s1429_s13 = int_to_ptr.vmem [resolvable:$true] %s188_s13 }
  0x3e   : > { %p1689_p1 = scmp.lt.s32.totalorder %s1223_s23, 4  ;;  %s1437_s6 = scalar_lea.sflag [#allocation7], %s177_s8 }
  0x3f   : > { %s1099_s7 = scalar_lea.hbm %s1427_s17, 2048  ;;  %s1104_s11 = scalar_lea.hbm %s1673_s2, 4096 }
  0x40   : > { %p1433_p3 = pnand %p1689_p1, %p97_p10  ;;  %p1100_p4 = scmp.ne.s32.totalorder %s1427_s17, %s1099_s7 }
  0x41   : > { %p1105_p12 = scmp.lt.u32.totalorder %s1427_s17, %s1673_s2  ;;  %p1106_p0 = scmp.lt.u32.totalorder %s1104_s11, %s1099_s7 }
  0x42   : > { %p1101_p2 = pneg %p1433_p3  ;;  %p1108_p11 = scmp.lt.u32.totalorder %s1099_s7, %s1427_s17 }
  0x43   : > { %p1107_p9 = por %p1106_p0, %p1105_p12 }
  0x44   : > { %p1102_p6 = pnand %p1101_p2, %p1100_p4 }
  0x45   : > { %p1109_p10 = por %p1108_p11, %p1107_p9 }
  0x46   : > { %p1103_p7 = pneg %p1102_p6 }
  0x48   : > { %p1110_p1 = pnand %p1109_p10, %p1103_p7 }
  0x4a   : > { %1113 = shalt.err (!%p1110_p1)
}
  0x4b   : > { %s1114_s8 = scalar_lea.vmem %s1429_s13, 2048  ;;  %s1229_s30 = smov [#allocation6]  }
  0x4c   : > { %p1115_p4 = scmp.ne.s32.totalorder %s1429_s13, %s1114_s8  ;;  %s1119_s10 = sshll.u32 %s1229_s30, 4  ;;  %s1120_s10 = int_to_ptr.vmem [resolvable:$false] %s1119_s10 }
  0x4d   : > { %s1121_s27 = scalar_lea.vmem %s1120_s10, 4096  ;;  %p1122_p8 = scmp.lt.s32.totalorder %s1429_s13, %s1120_s10 }
  0x4e   : > { %p1117_p6 = pnand %p1115_p4, %p1101_p2  ;;  %p1123_p12 = scmp.lt.s32.totalorder %s1121_s27, %s1114_s8 }
  0x50   : > { %p1118_p13 = pneg %p1117_p6  ;;  %p1124_p0 = por %p1123_p12, %p1122_p8 }
  0x52   : > { %p1125_p9 = pnand %p1124_p0, %p1118_p13 }
  0x54   : > { %1128 = shalt.err (!%p1125_p9)
}
  0x55   : > { %937 = dma.hbm_to_vmem [thread:$0]  (!%p1433_p3), %s1427_s17, 2048, %s1429_s13, %s1437_s6, %s1227_s25, %s1227_s25, %s1228_s4  }
  0x56   : > { %200 = sbr.rel (%p1394_p5) target bundleno = 561 (0x231), region = 32  ;;  %s202_s7 = sand.u32 (!%p1394_p5), 1, %s1199_s18  }
  0x57   : > { %s777_s11 = sshll.u32 (!%p1394_p5), %s202_s7, 7  ;;  %s203_s28 = scalar_lea.sflag (!%p1394_p5), [#allocation5], %s202_s7 }
  0x58   : > { %s1471_s8 = scalar_lea.vmem (!%p1394_p5), [#allocation4], %s777_s11  ;;  %p1691_p8 = scmp.ne.s32.totalorder (!%p1394_p5), %s1686_s12, 0 }
  0x5d   : > { %1174 = dma.done.wait (%p1691_p8), %s203_s28, 2048  }
  0x5e   : > { %1176 = vsyncadd (%p1691_p8), %s203_s28, 4294965248  ;;  %s211_s14 = sand.u32 1, %s1187_s15   ;;  %p1692_p5 = scmp.ne.s32.totalorder %s1688_s26, 0 }
  0x5f   : > { %s778_s30 = sshll.u32 %s211_s14, 7  ;;  %s212_s25 = scalar_lea.sflag [#allocation7], %s211_s14 }
  0x60   : > { %s1478_s4 = scalar_lea.vmem [#allocation6], %s778_s30 }
  0x61   : > { %1178 = dma.done.wait (%p1692_p5), %s212_s25, 2048  }
  0x62   : > { %1180 = vsyncadd (%p1692_p5), %s212_s25, 4294965248  ;;  %s779_s5 = sshll.u32 %s1211_s21, 4  ;;  %p781_p3 = scmp.ne.s32.totalorder %s1207_s20, 0 }
  0x63   : > { %p246_p13 = scmp.lt.s32.totalorder %s779_s5, 31  ;;  %v1230_v0 = vmov (!%p781_p3), 0.0  }
  0x64   : > { %254 = sbr.rel (%p781_p3) target bundleno = 108 (0x6c), region = 44  ;;  %255 = vst [vmem:[#allocation2] sm:$0xff] (!%p781_p3), %v1230_v0  ;;  %256 = vst [vmem:[#allocation2 + $0x8] sm:$0xff] (!%p781_p3), %v1230_v0 }
  0x65   : > { %s1711_s5 = smov (!%p246_p13, %s779_s5), 31  ;;  %257 = vst [vmem:[#allocation2 + $0x10] sm:$0xff] (!%p781_p3), %v1230_v0  ;;  %258 = vst [vmem:[#allocation2 + $0x18] sm:$0xff] (!%p781_p3), %v1230_v0 }
  0x66   : > { %s780_s13 = sshll.u32 %s1711_s5, 3  ;;  %259 = vst [vmem:[#allocation2 + $0x20] sm:$0xff] (!%p781_p3), %v1230_v0  ;;  %260 = vst [vmem:[#allocation2 + $0x28] sm:$0xff] (!%p781_p3), %v1230_v0 }
  0x67   : > { %s1488_s6 = scalar_lea.vmem %s1674_s3, %s780_s13  ;;  %261 = vst [vmem:[#allocation2 + $0x30] sm:$0xff] (!%p781_p3), %v1230_v0  ;;  %262 = vst [vmem:[#allocation2 + $0x38] sm:$0xff] (!%p781_p3), %v1230_v0 }
  0x68   : > { %263 = vst [vmem:[#allocation2 + $0x40] sm:$0xff] (!%p781_p3), %v1230_v0  ;;  %264 = vst [vmem:[#allocation2 + $0x48] sm:$0xff] (!%p781_p3), %v1230_v0 }
  0x69   : > { %265 = vst [vmem:[#allocation2 + $0x50] sm:$0xff] (!%p781_p3), %v1230_v0  ;;  %266 = vst [vmem:[#allocation2 + $0x58] sm:$0xff] (!%p781_p3), %v1230_v0 }
  0x6a   : > { %267 = vst [vmem:[#allocation2 + $0x60] sm:$0xff] (!%p781_p3), %v1230_v0  ;;  %268 = vst [vmem:[#allocation2 + $0x68] sm:$0xff] (!%p781_p3), %v1230_v0 }
  0x6b   : > { %269 = vst [vmem:[#allocation2 + $0x70] sm:$0xff] %v1230_v0  ;;  %270 = vst [vmem:[#allocation2 + $0x78] sm:$0xff] %v1230_v0 }
  0x6c PF: > { %v303_v1 = vld [vmem:[%s1478_s4] sm:$0xff]  ;;  %v304_v2 = vld [vmem:[%s1478_s4 + $0x8] sm:$0xff]  ;;  %v305_v3 = vld [vmem:[%s1478_s4 + $0x10] sm:$0xff]  ;;  %p782_p2 = scmp.ne.s32.totalorder %s1207_s20, 1 }
  0x6d   : > { %v875_v4 = vpack.c.bf16 %v304_v2, %v303_v1  ;;  %v306_v5 = vld [vmem:[%s1478_s4 + $0x18] sm:$0xff]  ;;  %v307_v7 = vld [vmem:[%s1478_s4 + $0x20] sm:$0xff]  ;;  %v308_v8 = vld [vmem:[%s1478_s4 + $0x28] sm:$0xff]  ;;  %s564_s21 = sld [smem:[#allocation3]] (!%p782_p2)  ;;  %s1231_s20 = smov (!%p782_p2), 0.0  }
  0x6e   : > { %v879_v6 = vpack.c.bf16 %v306_v5, %v305_v3  ;;  %v883_v9 = vpack.c.bf16 %v308_v8, %v307_v7  ;;  %v287_v10 = vld [vmem:[%s1471_s8] sm:$0xff]  ;;  %v309_v12 = vld [vmem:[%s1478_s4 + $0x30] sm:$0xff]  ;;  %v310_v13 = vld [vmem:[%s1478_s4 + $0x38] sm:$0xff]  ;;  %s1232_s10 = smov (!%p782_p2), 4.6052  }
  0x6f   : > { %876 = vmatprep.subr.bf16.mxu0 %v875_v4  ;;  %907 = vmatprep.subr.bf16.mxu1 %v875_v4  ;;  %v295_v11 = vld [vmem:[%s1471_s8 + $0x40] sm:$0xff]  ;;  %v887_v14 = vpack.c.bf16 %v310_v13, %v309_v12  ;;  %v312_v16 = vld [vmem:[%s1478_s4 + $0x48] sm:$0xff]  ;;  %v313_v18 = vld [vmem:[%s1478_s4 + $0x50] sm:$0xff] }
  0x70   : > { %878 = vmatpush3.bf16.msra.mxu0 %v875_v4  ;;  %915 = vmatpush3.bf16.msra.mxu1 %v875_v4  ;;  %v311_v15 = vld [vmem:[%s1478_s4 + $0x40] sm:$0xff]  ;;  %v314_v19 = vld [vmem:[%s1478_s4 + $0x58] sm:$0xff]  ;;  %v316_v22 = vld [vmem:[%s1478_s4 + $0x68] sm:$0xff] }
  0x71   : > { %880 = vmatprep.subr.bf16.mxu0 %v879_v6  ;;  %908 = vmatprep.subr.bf16.mxu1 %v879_v6  ;;  %v891_v17 = vpack.c.bf16 %v312_v16, %v311_v15  ;;  %v895_v20 = vpack.c.bf16 %v314_v19, %v313_v18  ;;  %v315_v21 = vld [vmem:[%s1478_s4 + $0x60] sm:$0xff]  ;;  %v317_v24 = vld [vmem:[%s1478_s4 + $0x70] sm:$0xff]  ;;  %v318_v25 = vld [vmem:[%s1478_s4 + $0x78] sm:$0xff] }
  0x72   : > { %851 = vmatprep.mubr.f32.mxu0 %v287_v10  ;;  %863 = vmatprep.mubr.f32.mxu1 %v295_v11  ;;  %v899_v23 = vpack.c.bf16 %v316_v22, %v315_v21  ;;  %v903_v26 = vpack.c.bf16 %v318_v25, %v317_v24  ;;  %v288_v27 = vld [vmem:[%s1471_s8 + $0x8] sm:$0xff]  ;;  %v289_v29 = vld [vmem:[%s1471_s8 + $0x10] sm:$0xff]  ;;  %v290_v31 = vld [vmem:[%s1471_s8 + $0x18] sm:$0xff] }
  0x73   : > { %v296_v28 = vld [vmem:[%s1471_s8 + $0x48] sm:$0xff]  ;;  %v297_v30 = vld [vmem:[%s1471_s8 + $0x50] sm:$0xff]  ;;  %v298_v32 = vld [vmem:[%s1471_s8 + $0x58] sm:$0xff]  ;;  %s565_s26 = smax.f32 (!%p782_p2), %s1231_s20, %s564_s21 }
  0x74   : > { %882 = vmatpush3.bf16.msra.mxu0 %v879_v6  ;;  %916 = vmatpush3.bf16.msra.mxu1 %v879_v6  ;;  %v291_v33 = vld [vmem:[%s1471_s8 + $0x20] sm:$0xff]  ;;  %v292_v35 = vld [vmem:[%s1471_s8 + $0x28] sm:$0xff]  ;;  %v293_v37 = vld [vmem:[%s1471_s8 + $0x30] sm:$0xff]  ;;  %s566_s27 = smin.f32 (!%p782_p2), %s1232_s10, %s565_s26 }
  0x75   : > { %884 = vmatprep.subr.bf16.mxu0 %v883_v9  ;;  %909 = vmatprep.subr.bf16.mxu1 %v883_v9  ;;  %v299_v34 = vld [vmem:[%s1471_s8 + $0x60] sm:$0xff]  ;;  %v300_v36 = vld [vmem:[%s1471_s8 + $0x68] sm:$0xff]  ;;  %v301_v38 = vld [vmem:[%s1471_s8 + $0x70] sm:$0xff] }
  0x76   : > { %v294_v39 = vld [vmem:[%s1471_s8 + $0x38] sm:$0xff]  ;;  %v272_v41 = vld [vmem:[#allocation2 + $0x8] sm:$0xff]  ;;  %v271_v43 = vld [vmem:[#allocation2] sm:$0xff] }
  0x77   : > { %v302_v40 = vld [vmem:[%s1471_s8 + $0x78] sm:$0xff]  ;;  %v280_v42 = vld [vmem:[#allocation2 + $0x48] sm:$0xff]  ;;  %v279_v44 = vld [vmem:[#allocation2 + $0x40] sm:$0xff] }
  0x78   : > { %886 = vmatpush3.bf16.msra.mxu0 %v883_v9  ;;  %917 = vmatpush3.bf16.msra.mxu1 %v883_v9  ;;  %v274_v53 = vld [vmem:[#allocation2 + $0x18] sm:$0xff]  ;;  %v273_v55 = vld [vmem:[#allocation2 + $0x10] sm:$0xff]  ;;  %v276_v1 = vld [vmem:[#allocation2 + $0x28] sm:$0xff] }
  0x79   : > { %888 = vmatprep.subr.bf16.mxu0 %v887_v14  ;;  %910 = vmatprep.subr.bf16.mxu1 %v887_v14  ;;  %v282_v54 = vld [vmem:[#allocation2 + $0x58] sm:$0xff]  ;;  %v281_v56 = vld [vmem:[#allocation2 + $0x50] sm:$0xff]  ;;  %v284_v2 = vld [vmem:[#allocation2 + $0x68] sm:$0xff] }
  0x7a   : > { %v275_v3 = vld [vmem:[#allocation2 + $0x20] sm:$0xff]  ;;  %v278_v13 = vld [vmem:[#allocation2 + $0x38] sm:$0xff]  ;;  %v277_v15 = vld [vmem:[#allocation2 + $0x30] sm:$0xff] }
  0x7b   : > { %v283_v4 = vld [vmem:[#allocation2 + $0x60] sm:$0xff]  ;;  %v285_v16 = vld [vmem:[#allocation2 + $0x70] sm:$0xff] }
  0x7c   : > { %890 = vmatpush3.bf16.msra.mxu0 %v887_v14  ;;  %918 = vmatpush3.bf16.msra.mxu1 %v887_v14  ;;  %v286_v14 = vld [vmem:[#allocation2 + $0x78] sm:$0xff] }
  0x7d   : > { %892 = vmatprep.subr.bf16.mxu0 %v891_v17  ;;  %911 = vmatprep.subr.bf16.mxu1 %v891_v17 }
  0x80   : > { %894 = vmatpush3.bf16.msra.mxu0 %v891_v17  ;;  %919 = vmatpush3.bf16.msra.mxu1 %v891_v17 }
  0x81   : > { %896 = vmatprep.subr.bf16.mxu0 %v895_v20  ;;  %912 = vmatprep.subr.bf16.mxu1 %v895_v20 }
  0x84   : > { %898 = vmatpush3.bf16.msra.mxu0 %v895_v20  ;;  %920 = vmatpush3.bf16.msra.mxu1 %v895_v20 }
  0x85   : > { %900 = vmatprep.subr.bf16.mxu0 %v899_v23  ;;  %913 = vmatprep.subr.bf16.mxu1 %v899_v23 }
  0x88   : > { %902 = vmatpush3.bf16.msra.mxu0 %v899_v23  ;;  %921 = vmatpush3.bf16.msra.mxu1 %v899_v23 }
  0x89   : > { %904 = vmatprep.subr.bf16.mxu0 %v903_v26  ;;  %914 = vmatprep.subr.bf16.mxu1 %v903_v26 }
  0x8c   : > { %906 = vmatpush3.bf16.msra.mxu0 %v903_v26  ;;  %922 = vmatpush3.bf16.msra.mxu1 %v903_v26 }
  0x8f   : > { %852 = vmatmul.mubr.f32.vlgmr.msra.gmra.mrb[0].mxu0 %v288_v27  ;;  %864 = vmatmul.mubr.f32.vlgmr.msra.gmra.mrb[0].mxu1 %v296_v28 }
  0x90   : > { %854 = vmatprep.mubr.f32.mxu0 %v289_v29  ;;  %866 = vmatprep.mubr.f32.mxu1 %v297_v30 }
  0x93   : > { %855 = vmatmul.mubr.f32.gmra.mrb[2].mxu0 %v290_v31  ;;  %867 = vmatmul.mubr.f32.gmra.mrb[2].mxu1 %v298_v32 }
  0x94   : > { %857 = vmatprep.mubr.f32.mxu0 %v291_v33  ;;  %869 = vmatprep.mubr.f32.mxu1 %v299_v34 }
  0x97   : > { %858 = vmatmul.mubr.f32.gmra.mrb[4].mxu0 %v292_v35  ;;  %870 = vmatmul.mubr.f32.gmra.mrb[4].mxu1 %v300_v36 }
  0x98   : > { %860 = vmatprep.mubr.f32.mxu0 %v293_v37  ;;  %872 = vmatprep.mubr.f32.mxu1 %v301_v38 }
  0x9b   : > { %861 = vmatmul.mubr.f32.gmra.mrb[6].mxu0 %v294_v39  ;;  %873 = vmatmul.mubr.f32.gmra.mrb[6].mxu1 %v302_v40  ;;  %v567_v39 = vstv (!%p782_p2), %s566_s27 }
  0x9c   : > { %v568_v40 = vmul.f32 (!%p782_p2), 1.442695, %v567_v39 }
  0x9e   : > { %1033 = vpow2.f32 (!%p782_p2), %v568_v40 }
 0x162   : > { %v853_v45 = vpop.f32.mrb[0].mxu0  ;;  %v865_v46 = vpop.f32.mrb[0].mxu1 }
 0x163   : > { %v465_v47 = vadd.f32 %v853_v45, %v272_v41  ;;  %v473_v48 = vadd.f32 %v865_v46, %v280_v42  ;;  %v385_v49 = vpop.f32.mrb[1].mxu0  ;;  %v425_v50 = vpop.f32.mrb[1].mxu1 }
 0x164   : > { %v464_v51 = vadd.f32 %v385_v49, %v271_v43  ;;  %v472_v52 = vadd.f32 %v425_v50, %v279_v44 }
 0x165   : > { %481 = vst [vmem:[#allocation2 + $0x8] sm:$0xff] %v465_v47  ;;  %489 = vst [vmem:[#allocation2 + $0x48] sm:$0xff] %v473_v48 }
 0x166   : > { %480 = vst [vmem:[#allocation2] sm:$0xff] %v464_v51  ;;  %488 = vst [vmem:[#allocation2 + $0x40] sm:$0xff] %v472_v52  ;;  %v856_v57 = vpop.f32.mrb[2].mxu0  ;;  %v868_v58 = vpop.f32.mrb[2].mxu1 }
 0x167   : > { %v467_v59 = vadd.f32 %v856_v57, %v274_v53  ;;  %v475_v60 = vadd.f32 %v868_v58, %v282_v54  ;;  %v395_v61 = vpop.f32.mrb[3].mxu0  ;;  %v435_v62 = vpop.f32.mrb[3].mxu1 }
 0x168   : > { %v466_v63 = vadd.f32 %v395_v61, %v273_v55  ;;  %v474_v0 = vadd.f32 %v435_v62, %v281_v56  ;;  %v1034_v53 = vpop.eup (!%p782_p2), %1033 }
 0x169   : > { %483 = vst [vmem:[#allocation2 + $0x18] sm:$0xff] %v467_v59  ;;  %491 = vst [vmem:[#allocation2 + $0x58] sm:$0xff] %v475_v60 }
 0x16a   : > { %482 = vst [vmem:[#allocation2 + $0x10] sm:$0xff] %v466_v63  ;;  %490 = vst [vmem:[#allocation2 + $0x50] sm:$0xff] %v474_v0  ;;  %v859_v5 = vpop.f32.mrb[4].mxu0  ;;  %v871_v6 = vpop.f32.mrb[4].mxu1 }
 0x16b   : > { %v469_v7 = vadd.f32 %v859_v5, %v276_v1  ;;  %v477_v8 = vadd.f32 %v871_v6, %v284_v2  ;;  %v405_v9 = vpop.f32.mrb[5].mxu0  ;;  %v445_v10 = vpop.f32.mrb[5].mxu1  ;;  %923 = vpush (!%p782_p2), %v1034_v53 }
 0x16c   : > { %v468_v11 = vadd.f32 %v405_v9, %v275_v3  ;;  %v476_v12 = vadd.f32 %v445_v10, %v283_v4  ;;  %499 = sbr.rel (%p782_p2) target bundleno = 561 (0x231), region = 48  ;;  %v1534_v30 = vld [vmem:[#allocation2 + $0x8] sm:$0xff] (!%p782_p2) }
 0x16d   : > { %485 = vst [vmem:[#allocation2 + $0x28] sm:$0xff] %v469_v7  ;;  %493 = vst [vmem:[#allocation2 + $0x68] sm:$0xff] %v477_v8  ;;  %v1526_v26 = vld [vmem:[#allocation2] sm:$0xff] (!%p782_p2)  ;;  %v517_v32 = vmul.f32 (!%p782_p2), %v1534_v30, %v1534_v30  ;;  %v1556_v43 = vld [vmem:[#allocation2 + $0x48] sm:$0xff] (!%p782_p2) }
 0x16e   : > { %484 = vst [vmem:[#allocation2 + $0x20] sm:$0xff] %v468_v11  ;;  %492 = vst [vmem:[#allocation2 + $0x60] sm:$0xff] %v476_v12  ;;  %v862_v17 = vpop.f32.mrb[6].mxu0  ;;  %v874_v18 = vpop.f32.mrb[6].mxu1  ;;  %v516_v29 = vmul.f32 (!%p782_p2), %v1526_v26, %v1526_v26  ;;  %v1558_v44 = vld [vmem:[#allocation2 + $0x40] sm:$0xff] (!%p782_p2)  ;;  %v525_v45 = vmul.f32 (!%p782_p2), %v1556_v43, %v1556_v43 }
 0x16f   : > { %v471_v19 = vadd.f32 %v862_v17, %v278_v13  ;;  %v479_v20 = vadd.f32 %v874_v18, %v286_v14  ;;  %v415_v21 = vpop.f32.mrb[7].mxu0  ;;  %v455_v22 = vpop.f32.mrb[7].mxu1  ;;  %v524_v46 = vmul.f32 (!%p782_p2), %v1558_v44, %v1558_v44 }
 0x170   : > { %v470_v23 = vadd.f32 %v415_v21, %v277_v15  ;;  %v478_v24 = vadd.f32 %v455_v22, %v285_v16  ;;  %v1528_v27 = vld [vmem:[#allocation2 + $0x18] sm:$0xff] (!%p782_p2)  ;;  %532 = vadd.xlane.f32.xlu0 (!%p782_p2), %v516_v29 }
 0x171   : > { %487 = vst [vmem:[#allocation2 + $0x38] sm:$0xff] %v471_v19  ;;  %495 = vst [vmem:[#allocation2 + $0x78] sm:$0xff] %v479_v20  ;;  %v1524_v25 = vld [vmem:[#allocation2 + $0x10] sm:$0xff] (!%p782_p2)  ;;  %v519_v31 = vmul.f32 (!%p782_p2), %v1528_v27, %v1528_v27  ;;  %v1564_v47 = vld [vmem:[#allocation2 + $0x58] sm:$0xff] (!%p782_p2) }
 0x172   : > { %486 = vst [vmem:[#allocation2 + $0x30] sm:$0xff] %v470_v23  ;;  %494 = vst [vmem:[#allocation2 + $0x70] sm:$0xff] %v478_v24  ;;  %v518_v28 = vmul.f32 (!%p782_p2), %v1524_v25, %v1524_v25  ;;  %v1566_v48 = vld [vmem:[#allocation2 + $0x50] sm:$0xff] (!%p782_p2)  ;;  %v527_v49 = vmul.f32 (!%p782_p2), %v1564_v47, %v1564_v47 }
 0x173   : > { %v526_v50 = vmul.f32 %v1566_v48, %v1566_v48 }
 0x174   : > { %536 = vadd.xlane.f32.xlu1 %v518_v28  ;;  %v1540_v33 = vld [vmem:[#allocation2 + $0x28] sm:$0xff]  ;;  %534 = vadd.xlane.f32.xlu0 %v517_v32 }
 0x175   : > { %v1542_v34 = vld [vmem:[#allocation2 + $0x20] sm:$0xff]  ;;  %v521_v35 = vmul.f32 %v1540_v33, %v1540_v33  ;;  %v1572_v51 = vld [vmem:[#allocation2 + $0x68] sm:$0xff] }
 0x176   : > { %v520_v36 = vmul.f32 %v1542_v34, %v1542_v34  ;;  %v1574_v52 = vld [vmem:[#allocation2 + $0x60] sm:$0xff]  ;;  %v529_v54 = vmul.f32 %v1572_v51, %v1572_v51 }
 0x177   : > { %v528_v55 = vmul.f32 %v1574_v52, %v1574_v52 }
 0x178   : > { %538 = vadd.xlane.f32.xlu1 %v519_v31  ;;  %v1548_v37 = vld [vmem:[#allocation2 + $0x38] sm:$0xff]  ;;  %540 = vadd.xlane.f32.xlu0 %v520_v36 }
 0x179   : > { %v1550_v38 = vld [vmem:[#allocation2 + $0x30] sm:$0xff]  ;;  %v523_v41 = vmul.f32 %v1548_v37, %v1548_v37  ;;  %v1580_v56 = vld [vmem:[#allocation2 + $0x78] sm:$0xff] }
 0x17a   : > { %v522_v42 = vmul.f32 %v1550_v38, %v1550_v38  ;;  %v1582_v57 = vld [vmem:[#allocation2 + $0x70] sm:$0xff]  ;;  %v531_v58 = vmul.f32 %v1580_v56, %v1580_v56 }
 0x17b   : > { %v530_v59 = vmul.f32 %v1582_v57, %v1582_v57 }
 0x17c   : > { %542 = vadd.xlane.f32.xlu1 %v521_v35  ;;  %544 = vadd.xlane.f32.xlu0 %v522_v42 }
 0x180   : > { %546 = vadd.xlane.f32.xlu1 %v523_v41  ;;  %548 = vadd.xlane.f32.xlu0 %v524_v46 }
 0x184   : > { %550 = vadd.xlane.f32.xlu1 %v525_v45  ;;  %552 = vadd.xlane.f32.xlu0 %v526_v50 }
 0x188   : > { %554 = vadd.xlane.f32.xlu1 %v527_v49  ;;  %556 = vadd.xlane.f32.xlu0 %v528_v55 }
 0x18c   : > { %558 = vadd.xlane.f32.xlu1 %v529_v54  ;;  %560 = vadd.xlane.f32.xlu0 %v530_v59 }
 0x190   : > { %562 = vadd.xlane.f32.xlu1 %v531_v58 }
 0x19c   : > { %s924_s7 = spop %923 }
 0x19d   : > { %v603_v60 = vstv %s924_s7 }
 0x19e   : > { %1035 = vrsqrt.f32 %v603_v60  ;;  %vm606_vm0 = vcmp.eq.f32.partialorder %v603_v60, inf  ;;  %v609_v62 = vand.u32 2147483648, %v603_v60  ;;  %vm608_vm1 = vcmp.eq.f32.partialorder %v603_v60, 0.0 }
 0x1a8   : > { %v1036_v61 = vpop.eup %1035 }
 0x1a9   : > { %v605_v63 = vmul.f32 %v1036_v61, %v603_v60 }
 0x1ab   : > { %v607_v0 = vsel %vm606_vm0, %v603_v60, %v605_v63 }
 0x1ac   : > { %v610_v1 = vsel %vm608_vm1, %v609_v62, %v607_v0 }
 0x1ad   : > { %925 = vpush %v610_v1 }
 0x1de   : > { %s926_s11 = spop %925 }
 0x1df   : > { %v1588_v14 = vstv %s926_s11 }
 0x1fd   : > { %v533_v3 = vpop.xlane.xlu0 %532 }
 0x1fe   : > { %v571_v5 = vadd.f32 1e-12, %v533_v3 }
 0x201   : > { %v537_v2 = vpop.xlane.xlu1 %536  ;;  %v535_v7 = vpop.xlane.xlu0 %534 }
 0x202   : > { %v573_v4 = vadd.f32 1e-12, %v537_v2  ;;  %v572_v9 = vadd.f32 1e-12, %v535_v7 }
 0x204   : > { %1037 = vrsqrt.f32 %v573_v4 }
 0x205   : > { %1039 = vrsqrt.f32 %v571_v5  ;;  %v539_v6 = vpop.xlane.xlu1 %538  ;;  %v541_v11 = vpop.xlane.xlu0 %540 }
 0x206   : > { %v574_v8 = vadd.f32 1e-12, %v539_v6  ;;  %v575_v13 = vadd.f32 1e-12, %v541_v11 }
 0x208   : > { %1041 = vrsqrt.f32 %v574_v8 }
 0x209   : > { %1043 = vrsqrt.f32 %v572_v9  ;;  %v543_v10 = vpop.xlane.xlu1 %542  ;;  %v545_v16 = vpop.xlane.xlu0 %544 }
 0x20a   : > { %v576_v12 = vadd.f32 1e-12, %v543_v10  ;;  %v577_v19 = vadd.f32 1e-12, %v545_v16 }
 0x20c   : > { %1045 = vrsqrt.f32 %v576_v12 }
 0x20d   : > { %1047 = vrsqrt.f32 %v575_v13  ;;  %v547_v15 = vpop.xlane.xlu1 %546  ;;  %v549_v28 = vpop.xlane.xlu0 %548 }
 0x20e   : > { %v1038_v17 = vpop.eup %1037  ;;  %v578_v18 = vadd.f32 1e-12, %v547_v15  ;;  %v579_v35 = vadd.f32 1e-12, %v549_v28 }
 0x20f   : > { %v1040_v20 = vpop.eup %1039  ;;  %v615_v21 = vmul.f32 %v1038_v17, %v1588_v14 }
 0x210   : > { %v613_v22 = vmul.f32 %v1040_v20, %v1588_v14  ;;  %1049 = vrsqrt.f32 %v578_v18 }
 0x211   : > { %v631_v23 = vmul.f32 %v615_v21, %v1524_v25  ;;  %1051 = vrsqrt.f32 %v577_v19  ;;  %v551_v24 = vpop.xlane.xlu1 %550  ;;  %v553_v42 = vpop.xlane.xlu0 %552 }
 0x212   : > { %v1042_v29 = vpop.eup %1041  ;;  %v629_v31 = vmul.f32 %v613_v22, %v1526_v26  ;;  %v580_v32 = vadd.f32 1e-12, %v551_v24  ;;  %v581_v49 = vadd.f32 1e-12, %v553_v42 }
 0x213   : > { %v1044_v36 = vpop.eup %1043  ;;  %v616_v39 = vmul.f32 %v1042_v29, %v1588_v14  ;;  %647 = vst [vmem:[%s1488_s6 + $0x10] sm:$0xff] %v631_v23 }
 0x214   : > { %v614_v40 = vmul.f32 %v1044_v36, %v1588_v14  ;;  %645 = vst [vmem:[%s1488_s6] sm:$0xff] %v629_v31  ;;  %1053 = vrsqrt.f32 %v580_v32 }
 0x215   : > { %v632_v25 = vmul.f32 %v616_v39, %v1528_v27  ;;  %1055 = vrsqrt.f32 %v579_v35  ;;  %v555_v41 = vpop.xlane.xlu1 %554  ;;  %v557_v58 = vpop.xlane.xlu0 %556 }
 0x216   : > { %v1046_v45 = vpop.eup %1045  ;;  %v630_v26 = vmul.f32 %v614_v40, %v1534_v30  ;;  %v582_v46 = vadd.f32 1e-12, %v555_v41  ;;  %v583_v61 = vadd.f32 1e-12, %v557_v58 }
 0x217   : > { %v1048_v50 = vpop.eup %1047  ;;  %v618_v53 = vmul.f32 %v1046_v45, %v1588_v14  ;;  %648 = vst [vmem:[%s1488_s6 + $0x18] sm:$0xff] %v632_v25 }
 0x218   : > { %v617_v54 = vmul.f32 %v1048_v50, %v1588_v14  ;;  %646 = vst [vmem:[%s1488_s6 + $0x8] sm:$0xff] %v630_v26  ;;  %1057 = vrsqrt.f32 %v582_v46 }
 0x219   : > { %v634_v27 = vmul.f32 %v618_v53, %v1540_v33  ;;  %1059 = vrsqrt.f32 %v581_v49  ;;  %v559_v55 = vpop.xlane.xlu1 %558  ;;  %v561_v2 = vpop.xlane.xlu0 %560 }
 0x21a   : > { %v1050_v59 = vpop.eup %1049  ;;  %v633_v30 = vmul.f32 %v617_v54, %v1542_v34  ;;  %v584_v60 = vadd.f32 1e-12, %v559_v55  ;;  %v585_v5 = vadd.f32 1e-12, %v561_v2 }
 0x21b   : > { %v1052_v62 = vpop.eup %1051  ;;  %650 = vst [vmem:[%s1488_s6 + $0x28] sm:$0xff] %v634_v27  ;;  %v620_v63 = vmul.f32 %v1050_v59, %v1588_v14 }
 0x21c   : > { %649 = vst [vmem:[%s1488_s6 + $0x20] sm:$0xff] %v633_v30  ;;  %v619_v0 = vmul.f32 %v1052_v62, %v1588_v14  ;;  %1061 = vrsqrt.f32 %v584_v60 }
 0x21d   : > { %v636_v33 = vmul.f32 %v620_v63, %v1548_v37  ;;  %1063 = vrsqrt.f32 %v583_v61  ;;  %v563_v1 = vpop.xlane.xlu1 %562 }
 0x21e   : > { %v1054_v3 = vpop.eup %1053  ;;  %v635_v34 = vmul.f32 %v619_v0, %v1550_v38  ;;  %v586_v4 = vadd.f32 1e-12, %v563_v1 }
 0x21f   : > { %v1056_v6 = vpop.eup %1055  ;;  %652 = vst [vmem:[%s1488_s6 + $0x38] sm:$0xff] %v636_v33  ;;  %v622_v7 = vmul.f32 %v1054_v3, %v1588_v14 }
 0x220   : > { %651 = vst [vmem:[%s1488_s6 + $0x30] sm:$0xff] %v635_v34  ;;  %v621_v8 = vmul.f32 %v1056_v6, %v1588_v14  ;;  %1065 = vrsqrt.f32 %v586_v4 }
 0x221   : > { %v638_v37 = vmul.f32 %v622_v7, %v1556_v43  ;;  %1067 = vrsqrt.f32 %v585_v5 }
 0x222   : > { %v1058_v9 = vpop.eup %1057  ;;  %v637_v10 = vmul.f32 %v621_v8, %v1558_v44 }
 0x223   : > { %v1060_v38 = vpop.eup %1059  ;;  %654 = vst [vmem:[%s1488_s6 + $0x48] sm:$0xff] %v638_v37  ;;  %v624_v11 = vmul.f32 %v1058_v9, %v1588_v14 }
 0x224   : > { %653 = vst [vmem:[%s1488_s6 + $0x40] sm:$0xff] %v637_v10  ;;  %v623_v12 = vmul.f32 %v1060_v38, %v1588_v14 }
 0x225   : > { %v640_v13 = vmul.f32 %v624_v11, %v1564_v47 }
 0x226   : > { %v1062_v15 = vpop.eup %1061  ;;  %v639_v16 = vmul.f32 %v623_v12, %v1566_v48 }
 0x227   : > { %v1064_v43 = vpop.eup %1063  ;;  %656 = vst [vmem:[%s1488_s6 + $0x58] sm:$0xff] %v640_v13  ;;  %v626_v44 = vmul.f32 %v1062_v15, %v1588_v14 }
 0x228   : > { %655 = vst [vmem:[%s1488_s6 + $0x50] sm:$0xff] %v639_v16  ;;  %v625_v17 = vmul.f32 %v1064_v43, %v1588_v14 }
 0x229   : > { %v642_v18 = vmul.f32 %v626_v44, %v1572_v51 }
 0x22a   : > { %v1066_v19 = vpop.eup %1065  ;;  %v641_v20 = vmul.f32 %v625_v17, %v1574_v52 }
 0x22b   : > { %v1068_v21 = vpop.eup %1067  ;;  %658 = vst [vmem:[%s1488_s6 + $0x68] sm:$0xff] %v642_v18  ;;  %v628_v47 = vmul.f32 %v1066_v19, %v1588_v14 }
 0x22c   : > { %657 = vst [vmem:[%s1488_s6 + $0x60] sm:$0xff] %v641_v20  ;;  %v627_v48 = vmul.f32 %v1068_v21, %v1588_v14 }
 0x22d   : > { %v644_v22 = vmul.f32 %v628_v47, %v1580_v56 }
 0x22e   : > { %v643_v23 = vmul.f32 %v627_v48, %v1582_v57 }
 0x22f   : > { %660 = vst [vmem:[%s1488_s6 + $0x78] sm:$0xff] %v644_v22 }
 0x230   : > { %659 = vst [vmem:[%s1488_s6 + $0x70] sm:$0xff] %v643_v23 }
 0x231 PF: > { %s20_s23 = sadd.s32 1, %s1223_s23   ;;  %s1693_s28 = sld [smem:[#allocation10_spill]] }
 0x232   : > { %p17_p7 = scmp.ge.s32.totalorder %s20_s23, 6   ;;  %s1694_s14 = smov %s1187_s15 }
 0x233   : > { %s1695_s15 = smov %s1191_s16  ;;  %s1696_s16 = smov %s1405_s29 }
 0x234   : > { %s1697_s17 = smov %s1199_s18  ;;  %s1698_s18 = smov %s1203_s19 }
 0x235   : > { %s1699_s19 = smov %s1342_s9  ;;  %s1700_s20 = smov %s1215_s0 }
 0x236   : > { %s1701_s21 = smov %s1219_s22  ;;  %s1702_s0 = smov %s1705_s24 }
 0x237   : > { %s1703_s22 = smov %s1693_s28  ;;  %19 = sbr.rel (!%p17_p7) target bundleno = 11 (0xb), region = 93 }
 0x23e   :  { %683 = vsyncpa [#allocation5], 1 }
 0x23f   :  { %685 = vsyncpa [#allocation5 + $0x1], 1 }
 0x240   :  { %686 = vsyncpa [#allocation7], 1 }
 0x241   :  { %688 = vsyncpa [#allocation7 + $0x1], 1 }

// kernel: infonce_loss.3
= control target key start
LH: loop header
LB: loop body
LE: loop exit
PB: predicated region body
PF: predicated region fallthrough
CT: control target
= control target key end

     0   :  { %s1346_s14 = smov 0   ;;  %s1348_s15 = smov 0   ;;  %s1795_s0 = inlined_call_operand.<no memory space> [shape: f32[1], index: 0, kind: input, shape index: {}]   ;;  %s1796_s1 = inlined_call_operand.vmem [shape: f32[256,128], index: 1, kind: input, shape index: {}, may-alias: {1,2}]   ;;  %s1797_s2 = inlined_call_operand.vmem [shape: f32[256,128], index: 2, kind: input, shape index: {}, may-alias: {1,2}]   ;;  %s1798_s3 = inlined_call_operand.vmem [shape: f32[256,1], index: 3, kind: output, shape index: {}]  }
   0x1   :  { %8 = sst [smem:[#allocation4]] %s1795_s0  ;;  %s1350_s16 = smov 0  }
   0x2   :  { %s1352_s17 = smov 0   ;;  %s1354_s18 = smov 0  }
   0x3 LB: > { %s23_s0 = sadd.s32 1, %s1308_s16  ;;  %s26_s19 = sadd.s32 1, %s1312_s17  ;;  %s1316_s18 = sphi %s1354_s18, %s14_s18   ;;  %s1312_s17 = sphi %s1352_s17, %s1817_s17   ;;  %s1308_s16 = sphi %s1350_s16, %s1816_s16   ;;  %s1304_s15 = sphi %s1348_s15, %s1815_s15   ;;  %s1300_s14 = sphi %s1346_s14, %s1814_s14  }
   0x4   : > { %p24_p0 = scmp.ge.s32.totalorder %s23_s0, 2  ;;  %p984_p1 = scmp.ge.s32.totalorder %s1316_s18, 1 }
   0x5   : > { %p162_p2 = scmp.lt.s32.totalorder %s1316_s18, 5 }
   0x6   : > { %s1819_s0 = smov (%p24_p0, %s23_s0), 0  ;;  %s1821_s19 = smov (!%p24_p0, %s26_s19), %s1312_s17 }
   0x7   : > { %p163_p3 = pnand %p984_p1, %p162_p2  ;;  %p28_p4 = scmp.ge.s32.totalorder %s1821_s19, 2 }
   0x8   : > { %s985_s20 = sshll.u32 (!%p163_p3), %s1304_s15, 4  ;;  %s987_s21 = sshll.u32 (!%p163_p3), %s1300_s14, 4 }
   0x9   : > { %s1823_s19 = smov (%p28_p4, %s1821_s19), 0  ;;  %166 = sbr.rel (%p163_p3) target bundleno = 819 (0x333), region = 32 }
   0xa   : > { %p192_p5 = scmp.lt.s32.totalorder (!%p163_p3), %s985_s20, 31  ;;  %p198_p6 = scmp.lt.s32.totalorder (!%p163_p3), %s987_s21, 31 }
   0xb   : > { %p991_p7 = scmp.ne.s32.totalorder (!%p163_p3), %s1300_s14, 0 }
  0x10   : > { %s1825_s20 = smov (!%p192_p5, %s985_s20), 31  ;;  %s1827_s21 = smov (!%p198_p6, %s987_s21), 31 }
  0x11   : > { %s986_s22 = sshll.u32 %s1825_s20, 3  ;;  %s988_s26 = sshll.u32 %s1827_s21, 3  ;;  %vm213_vm0 = vcmask (!%p991_p7), 7168   ;;  %v1318_v0 = vmov (!%p991_p7), -inf   ;;  %v1319_v1 = vmov (!%p991_p7), 0.0  }
  0x12   : > { %s1382_s25 = scalar_lea.vmem %s1796_s1, %s986_s22  ;;  %s1387_s29 = scalar_lea.vmem %s1797_s2, %s988_s26  ;;  %214 = vst.msk [vmem:[#allocation2] sm:$0xff] (!%p991_p7), %vm213_vm0, %v1318_v0  ;;  %215 = vst.msk [vmem:[#allocation2 + $0x8] sm:$0xff] (!%p991_p7), %vm213_vm0, %v1318_v0 }
  0x13   : > { %s1392_s5 = scalar_lea.vmem %s1798_s3, %s986_s22  ;;  %212 = sbr.rel (%p991_p7) target bundleno = 34 (0x22), region = 36  ;;  %216 = vst.msk [vmem:[#allocation2 + $0x10] sm:$0xff] (!%p991_p7), %vm213_vm0, %v1318_v0  ;;  %217 = vst.msk [vmem:[#allocation2 + $0x18] sm:$0xff] (!%p991_p7), %vm213_vm0, %v1318_v0 }
  0x14   : > { %218 = vst.msk [vmem:[#allocation2 + $0x20] sm:$0xff] (!%p991_p7), %vm213_vm0, %v1318_v0  ;;  %219 = vst.msk [vmem:[#allocation2 + $0x28] sm:$0xff] (!%p991_p7), %vm213_vm0, %v1318_v0 }
  0x15   : > { %220 = vst.msk [vmem:[#allocation2 + $0x30] sm:$0xff] (!%p991_p7), %vm213_vm0, %v1318_v0  ;;  %221 = vst.msk [vmem:[#allocation2 + $0x38] sm:$0xff] (!%p991_p7), %vm213_vm0, %v1318_v0 }
  0x16   : > { %222 = vst.msk [vmem:[#allocation2 + $0x40] sm:$0xff] (!%p991_p7), %vm213_vm0, %v1318_v0  ;;  %223 = vst.msk [vmem:[#allocation2 + $0x48] sm:$0xff] (!%p991_p7), %vm213_vm0, %v1318_v0 }
  0x17   : > { %224 = vst.msk [vmem:[#allocation2 + $0x50] sm:$0xff] (!%p991_p7), %vm213_vm0, %v1318_v0  ;;  %225 = vst.msk [vmem:[#allocation2 + $0x58] sm:$0xff] (!%p991_p7), %vm213_vm0, %v1318_v0 }
  0x18   : > { %226 = vst.msk [vmem:[#allocation2 + $0x60] sm:$0xff] (!%p991_p7), %vm213_vm0, %v1318_v0  ;;  %227 = vst.msk [vmem:[#allocation2 + $0x68] sm:$0xff] (!%p991_p7), %vm213_vm0, %v1318_v0 }
  0x19   : > { %228 = vst.msk [vmem:[#allocation2 + $0x70] sm:$0xff] (!%p991_p7), %vm213_vm0, %v1318_v0  ;;  %229 = vst.msk [vmem:[#allocation2 + $0x78] sm:$0xff] (!%p991_p7), %vm213_vm0, %v1318_v0 }
  0x1a   : > { %230 = vst.msk [vmem:[#allocation3] sm:$0xff] %vm213_vm0, %v1319_v1  ;;  %231 = vst.msk [vmem:[#allocation3 + $0x8] sm:$0xff] %vm213_vm0, %v1319_v1 }
  0x1b   : > { %232 = vst.msk [vmem:[#allocation3 + $0x10] sm:$0xff] %vm213_vm0, %v1319_v1  ;;  %233 = vst.msk [vmem:[#allocation3 + $0x18] sm:$0xff] %vm213_vm0, %v1319_v1 }
  0x1c   : > { %234 = vst.msk [vmem:[#allocation3 + $0x20] sm:$0xff] %vm213_vm0, %v1319_v1  ;;  %235 = vst.msk [vmem:[#allocation3 + $0x28] sm:$0xff] %vm213_vm0, %v1319_v1 }
  0x1d   : > { %236 = vst.msk [vmem:[#allocation3 + $0x30] sm:$0xff] %vm213_vm0, %v1319_v1  ;;  %237 = vst.msk [vmem:[#allocation3 + $0x38] sm:$0xff] %vm213_vm0, %v1319_v1 }
  0x1e   : > { %238 = vst.msk [vmem:[#allocation3 + $0x40] sm:$0xff] %vm213_vm0, %v1319_v1  ;;  %239 = vst.msk [vmem:[#allocation3 + $0x48] sm:$0xff] %vm213_vm0, %v1319_v1 }
  0x1f   : > { %240 = vst.msk [vmem:[#allocation3 + $0x50] sm:$0xff] %vm213_vm0, %v1319_v1  ;;  %241 = vst.msk [vmem:[#allocation3 + $0x58] sm:$0xff] %vm213_vm0, %v1319_v1 }
  0x20   : > { %242 = vst.msk [vmem:[#allocation3 + $0x60] sm:$0xff] %vm213_vm0, %v1319_v1  ;;  %243 = vst.msk [vmem:[#allocation3 + $0x68] sm:$0xff] %vm213_vm0, %v1319_v1 }
  0x21   : > { %244 = vst.msk [vmem:[#allocation3 + $0x70] sm:$0xff] %vm213_vm0, %v1319_v1  ;;  %245 = vst.msk [vmem:[#allocation3 + $0x78] sm:$0xff] %vm213_vm0, %v1319_v1 }
  0x22 PF: > { %v262_v2 = vld [vmem:[%s1387_s29] sm:$0xff]  ;;  %v263_v3 = vld [vmem:[%s1387_s29 + $0x8] sm:$0xff]  ;;  %v264_v4 = vld [vmem:[%s1387_s29 + $0x10] sm:$0xff]  ;;  %v1320_v58 = vmov 0   ;;  %vm743_vm1 = vcmask 7168   ;;  %p992_p8 = scmp.ne.s32.totalorder %s1300_s14, 1 }
  0x23   : > { %v1083_v5 = vpack.c.bf16 %v263_v3, %v262_v2  ;;  %v265_v6 = vld [vmem:[%s1387_s29 + $0x18] sm:$0xff]  ;;  %v246_v8 = vld [vmem:[%s1382_s25] sm:$0xff]  ;;  %v267_v11 = vld [vmem:[%s1387_s29 + $0x28] sm:$0xff]  ;;  %1179 = vset.pattern.permute.xlu0 %v1320_v58  ;;  %1178 = vset.pattern.permute.xlu1 %v1320_v58  ;;  %s780_s6 = sld [smem:[#allocation4]] (!%p992_p8)  ;;  %s1321_s7 = smov (!%p992_p8), 0.0  }
  0x24   : > { %v1087_v7 = vpack.c.bf16 %v265_v6, %v264_v4  ;;  %v254_v9 = vld [vmem:[%s1382_s25 + $0x40] sm:$0xff]  ;;  %1059 = vmatprep.mubr.f32.mxu0 %v246_v8  ;;  %v268_v13 = vld [vmem:[%s1387_s29 + $0x30] sm:$0xff]  ;;  %v269_v14 = vld [vmem:[%s1387_s29 + $0x38] sm:$0xff]  ;;  %s1322_s9 = smov (!%p992_p8), 4.6052  }
  0x25   : > { %1084 = vmatprep.subr.bf16.mxu0 %v1083_v5  ;;  %1115 = vmatprep.subr.bf16.mxu1 %v1083_v5  ;;  %v266_v10 = vld [vmem:[%s1387_s29 + $0x20] sm:$0xff]  ;;  %v1095_v15 = vpack.c.bf16 %v269_v14, %v268_v13  ;;  %v271_v17 = vld [vmem:[%s1387_s29 + $0x48] sm:$0xff]  ;;  %v272_v19 = vld [vmem:[%s1387_s29 + $0x50] sm:$0xff] }
  0x26   : > { %1086 = vmatpush3.bf16.xpose.msra.mxu0 %v1083_v5  ;;  %1123 = vmatpush3.bf16.xpose.msra.mxu1 %v1083_v5  ;;  %v1091_v12 = vpack.c.bf16 %v267_v11, %v266_v10  ;;  %v270_v16 = vld [vmem:[%s1387_s29 + $0x40] sm:$0xff]  ;;  %v273_v20 = vld [vmem:[%s1387_s29 + $0x58] sm:$0xff]  ;;  %v275_v23 = vld [vmem:[%s1387_s29 + $0x68] sm:$0xff] }
  0x27   : > { %1088 = vmatprep.subr.bf16.mxu0 %v1087_v7  ;;  %1116 = vmatprep.subr.bf16.mxu1 %v1087_v7  ;;  %v1099_v18 = vpack.c.bf16 %v271_v17, %v270_v16  ;;  %v1103_v21 = vpack.c.bf16 %v273_v20, %v272_v19  ;;  %v274_v22 = vld [vmem:[%s1387_s29 + $0x60] sm:$0xff]  ;;  %v276_v25 = vld [vmem:[%s1387_s29 + $0x70] sm:$0xff]  ;;  %v277_v26 = vld [vmem:[%s1387_s29 + $0x78] sm:$0xff] }
  0x28   : > { %1071 = vmatprep.mubr.f32.mxu1 %v254_v9  ;;  %v1107_v24 = vpack.c.bf16 %v275_v23, %v274_v22  ;;  %v1111_v27 = vpack.c.bf16 %v277_v26, %v276_v25  ;;  %v247_v28 = vld [vmem:[%s1382_s25 + $0x8] sm:$0xff]  ;;  %v248_v30 = vld [vmem:[%s1382_s25 + $0x10] sm:$0xff]  ;;  %v249_v32 = vld [vmem:[%s1382_s25 + $0x18] sm:$0xff] }
  0x29   : > { %v255_v29 = vld [vmem:[%s1382_s25 + $0x48] sm:$0xff]  ;;  %v256_v31 = vld [vmem:[%s1382_s25 + $0x50] sm:$0xff]  ;;  %v257_v33 = vld [vmem:[%s1382_s25 + $0x58] sm:$0xff]  ;;  %s781_s8 = smax.f32 (!%p992_p8), %s1321_s7, %s780_s6 }
  0x2a   : > { %v250_v34 = vld [vmem:[%s1382_s25 + $0x20] sm:$0xff]  ;;  %v251_v36 = vld [vmem:[%s1382_s25 + $0x28] sm:$0xff]  ;;  %v252_v38 = vld [vmem:[%s1382_s25 + $0x30] sm:$0xff]  ;;  %s782_s10 = smin.f32 (!%p992_p8), %s1322_s9, %s781_s8 }
  0x2b   : > { %v258_v35 = vld [vmem:[%s1382_s25 + $0x60] sm:$0xff]  ;;  %v259_v37 = vld [vmem:[%s1382_s25 + $0x68] sm:$0xff]  ;;  %v260_v39 = vld [vmem:[%s1382_s25 + $0x70] sm:$0xff] }
  0x2c   : > { %v253_v40 = vld [vmem:[%s1382_s25 + $0x38] sm:$0xff]  ;;  %v1507_v59 = vld [vmem:[#allocation2 + $0x48] sm:$0xff]  ;;  %v1517_v1 = vld [vmem:[#allocation2] sm:$0xff] }
  0x2d   : > { %v261_v41 = vld [vmem:[%s1382_s25 + $0x78] sm:$0xff]  ;;  %v1509_v60 = vld [vmem:[#allocation2 + $0x8] sm:$0xff]  ;;  %v1537_v9 = vld [vmem:[#allocation2 + $0x40] sm:$0xff] }
  0x2e   : > { %1090 = vmatpush3.bf16.xpose.msra.mxu0 %v1087_v7  ;;  %1124 = vmatpush3.bf16.xpose.msra.mxu1 %v1087_v7  ;;  %v1519_v2 = vld [vmem:[#allocation2 + $0x18] sm:$0xff]  ;;  %v1556_v17 = vld [vmem:[#allocation2 + $0x50] sm:$0xff]  ;;  %v1576_v25 = vld [vmem:[#allocation2 + $0x28] sm:$0xff] }
  0x2f   : > { %1092 = vmatprep.subr.bf16.mxu0 %v1091_v12  ;;  %1117 = vmatprep.subr.bf16.mxu1 %v1091_v12  ;;  %v1539_v10 = vld [vmem:[#allocation2 + $0x58] sm:$0xff]  ;;  %v1578_v26 = vld [vmem:[#allocation2 + $0x20] sm:$0xff]  ;;  %v1616_v58 = vld [vmem:[#allocation2 + $0x30] sm:$0xff] }
  0x36   : > { %1094 = vmatpush3.bf16.xpose.msra.mxu0 %v1091_v12  ;;  %1125 = vmatpush3.bf16.xpose.msra.mxu1 %v1091_v12 }
  0x37   : > { %1096 = vmatprep.subr.bf16.mxu0 %v1095_v15  ;;  %1118 = vmatprep.subr.bf16.mxu1 %v1095_v15 }
  0x3e   : > { %1098 = vmatpush3.bf16.xpose.msra.mxu0 %v1095_v15  ;;  %1126 = vmatpush3.bf16.xpose.msra.mxu1 %v1095_v15 }
  0x3f   : > { %1100 = vmatprep.subr.bf16.mxu0 %v1099_v18  ;;  %1119 = vmatprep.subr.bf16.mxu1 %v1099_v18 }
  0x46   : > { %1102 = vmatpush3.bf16.xpose.msra.mxu0 %v1099_v18  ;;  %1127 = vmatpush3.bf16.xpose.msra.mxu1 %v1099_v18  ;;  %v1558_v18 = vld [vmem:[#allocation2 + $0x10] sm:$0xff] }
  0x47   : > { %1104 = vmatprep.subr.bf16.mxu0 %v1103_v21  ;;  %1120 = vmatprep.subr.bf16.mxu1 %v1103_v21 }
  0x4e   : > { %1106 = vmatpush3.bf16.xpose.msra.mxu0 %v1103_v21  ;;  %1128 = vmatpush3.bf16.xpose.msra.mxu1 %v1103_v21 }
  0x4f   : > { %1108 = vmatprep.subr.bf16.mxu0 %v1107_v24  ;;  %1121 = vmatprep.subr.bf16.mxu1 %v1107_v24 }
  0x56   : > { %1110 = vmatpush3.bf16.xpose.msra.mxu0 %v1107_v24  ;;  %1129 = vmatpush3.bf16.xpose.msra.mxu1 %v1107_v24 }
  0x57   : > { %1112 = vmatprep.subr.bf16.mxu0 %v1111_v27  ;;  %1122 = vmatprep.subr.bf16.mxu1 %v1111_v27 }
  0x5e   : > { %1114 = vmatpush3.bf16.xpose.msra.mxu0 %v1111_v27  ;;  %1130 = vmatpush3.bf16.xpose.msra.mxu1 %v1111_v27 }
  0x65   : > { %1060 = vmatmul.mubr.f32.vlgmr.msra.gmra.mrb[0].mxu0 %v247_v28  ;;  %1072 = vmatmul.mubr.f32.vlgmr.msra.gmra.mrb[0].mxu1 %v255_v29 }
  0x66   : > { %1062 = vmatprep.mubr.f32.mxu0 %v248_v30  ;;  %1074 = vmatprep.mubr.f32.mxu1 %v256_v31 }
  0x69   : > { %1063 = vmatmul.mubr.f32.gmra.mrb[2].mxu0 %v249_v32  ;;  %1075 = vmatmul.mubr.f32.gmra.mrb[2].mxu1 %v257_v33  ;;  %v1595_v33 = vld [vmem:[#allocation2 + $0x68] sm:$0xff] }
  0x6a   : > { %1065 = vmatprep.mubr.f32.mxu0 %v250_v34  ;;  %1077 = vmatprep.mubr.f32.mxu1 %v258_v35  ;;  %v1597_v34 = vld [vmem:[#allocation2 + $0x60] sm:$0xff] }
  0x6d   : > { %1066 = vmatmul.mubr.f32.gmra.mrb[4].mxu0 %v251_v36  ;;  %1078 = vmatmul.mubr.f32.gmra.mrb[4].mxu1 %v259_v37 }
  0x6e   : > { %1068 = vmatprep.mubr.f32.mxu0 %v252_v38  ;;  %1080 = vmatprep.mubr.f32.mxu1 %v260_v39 }
  0x71   : > { %1069 = vmatmul.mubr.f32.gmra.mrb[6].mxu0 %v253_v40  ;;  %1081 = vmatmul.mubr.f32.gmra.mrb[6].mxu1 %v261_v41  ;;  %v1614_v41 = vld [vmem:[#allocation2 + $0x38] sm:$0xff] }
 0x138   : > { %v1459_v42 = vpop.f32.mrb[0].mxu0  ;;  %v1461_v43 = vpop.f32.mrb[0].mxu1 }
 0x139   : > { %457 = vmax.xlane.f32.xlu1 %v1461_v43  ;;  %441 = vmax.xlane.f32.xlu0 %v1459_v42  ;;  %v1465_v44 = vpop.f32.mrb[1].mxu0  ;;  %v1467_v45 = vpop.f32.mrb[1].mxu1 }
 0x13c   : > { %v1469_v46 = vpop.f32.mrb[2].mxu0  ;;  %v1471_v47 = vpop.f32.mrb[2].mxu1 }
 0x13d   : > { %439 = vmax.xlane.f32.xlu0 %v1465_v44  ;;  %445 = vmax.xlane.f32.xlu1 %v1469_v46  ;;  %v1475_v48 = vpop.f32.mrb[3].mxu0  ;;  %v1477_v49 = vpop.f32.mrb[3].mxu1 }
 0x140   : > { %v1479_v50 = vpop.f32.mrb[4].mxu0  ;;  %v1481_v51 = vpop.f32.mrb[4].mxu1 }
 0x141   : > { %455 = vmax.xlane.f32.xlu0 %v1467_v45  ;;  %461 = vmax.xlane.f32.xlu1 %v1471_v47  ;;  %v1485_v52 = vpop.f32.mrb[5].mxu0  ;;  %v1487_v53 = vpop.f32.mrb[5].mxu1 }
 0x144   : > { %v1489_v54 = vpop.f32.mrb[6].mxu0  ;;  %v1491_v55 = vpop.f32.mrb[6].mxu1 }
 0x145   : > { %459 = vmax.xlane.f32.xlu0 %v1477_v49  ;;  %443 = vmax.xlane.f32.xlu1 %v1475_v48  ;;  %v1495_v56 = vpop.f32.mrb[7].mxu0  ;;  %v1497_v57 = vpop.f32.mrb[7].mxu1 }
 0x149   : > { %449 = vmax.xlane.f32.xlu1 %v1479_v50  ;;  %447 = vmax.xlane.f32.xlu0 %v1485_v52 }
 0x14d   : > { %465 = vmax.xlane.f32.xlu1 %v1481_v51  ;;  %463 = vmax.xlane.f32.xlu0 %v1487_v53 }
 0x151   : > { %453 = vmax.xlane.f32.xlu1 %v1489_v54  ;;  %451 = vmax.xlane.f32.xlu0 %v1495_v56 }
 0x155   : > { %469 = vmax.xlane.f32.xlu1 %v1491_v55  ;;  %467 = vmax.xlane.f32.xlu0 %v1497_v57 }
 0x1c6   : > { %v458_v61 = vpop.xlane.xlu1 %457  ;;  %v442_v62 = vpop.xlane.xlu0 %441 }
 0x1c7   : > { %v1512_v63 = vmax.f32 %v1507_v59, %v458_v61  ;;  %v1515_v0 = vmax.f32 %v1509_v60, %v442_v62 }
 0x1c9   : > { %769 = vst.msk [vmem:[#allocation2 + $0x48] sm:$0xff] %vm743_vm1, %v1512_v63  ;;  %v488_v4 = vsub.f32 %v1509_v60, %v1515_v0  ;;  %761 = vst.msk [vmem:[#allocation2 + $0x8] sm:$0xff] %vm743_vm1, %v1515_v0  ;;  %542 = vperm.xlu1 %1178, %v1515_v0   ;;  %582 = vperm.xlu0 %1179, %v1512_v63  }
 0x1ca   : > { %v440_v5 = vpop.xlane.xlu0 %439  ;;  %v446_v6 = vpop.xlane.xlu1 %445 }
 0x1cb   : > { %v1532_v7 = vmax.f32 %v1517_v1, %v440_v5  ;;  %v1535_v8 = vmax.f32 %v1519_v2, %v446_v6 }
 0x1cd   : > { %760 = vst.msk [vmem:[#allocation2] sm:$0xff] %vm743_vm1, %v1532_v7  ;;  %763 = vst.msk [vmem:[#allocation2 + $0x18] sm:$0xff] %vm743_vm1, %v1535_v8  ;;  %537 = vperm.xlu0 %1179, %v1532_v7  }
 0x1ce   : > { %v456_v13 = vpop.xlane.xlu0 %455  ;;  %v462_v14 = vpop.xlane.xlu1 %461 }
 0x1cf   : > { %v1551_v15 = vmax.f32 %v1537_v9, %v456_v13  ;;  %v1554_v16 = vmax.f32 %v1539_v10, %v462_v14 }
 0x1d1   : > { %768 = vst.msk [vmem:[#allocation2 + $0x40] sm:$0xff] %vm743_vm1, %v1551_v15  ;;  %771 = vst.msk [vmem:[#allocation2 + $0x58] sm:$0xff] %vm743_vm1, %v1554_v16  ;;  %577 = vperm.xlu1 %1178, %v1551_v15   ;;  %592 = vperm.xlu0 %1179, %v1554_v16  }
 0x1d2   : > { %v460_v21 = vpop.xlane.xlu0 %459  ;;  %v444_v22 = vpop.xlane.xlu1 %443 }
 0x1d3   : > { %v1571_v23 = vmax.f32 %v1556_v17, %v460_v21  ;;  %v1574_v24 = vmax.f32 %v1558_v18, %v444_v22  ;;  %v1634_v21 = vld [vmem:[#allocation2 + $0x78] sm:$0xff]  ;;  %v1636_v22 = vld [vmem:[#allocation2 + $0x70] sm:$0xff] }
 0x1d5   : > { %770 = vst.msk [vmem:[#allocation2 + $0x50] sm:$0xff] %vm743_vm1, %v1571_v23  ;;  %762 = vst.msk [vmem:[#allocation2 + $0x10] sm:$0xff] %vm743_vm1, %v1574_v24  ;;  %552 = vperm.xlu1 %1178, %v1535_v8  }
 0x1d6   : > { %v450_v29 = vpop.xlane.xlu1 %449  ;;  %v448_v30 = vpop.xlane.xlu0 %447 }
 0x1d7   : > { %v1590_v31 = vmax.f32 %v1576_v25, %v450_v29  ;;  %v1593_v32 = vmax.f32 %v1578_v26, %v448_v30 }
 0x1d9   : > { %765 = vst.msk [vmem:[#allocation2 + $0x28] sm:$0xff] %vm743_vm1, %v1590_v31  ;;  %547 = vperm.xlu1 %1178, %v1574_v24   ;;  %764 = vst.msk [vmem:[#allocation2 + $0x20] sm:$0xff] %vm743_vm1, %v1593_v32 }
 0x1da   : > { %v466_v37 = vpop.xlane.xlu1 %465  ;;  %v464_v38 = vpop.xlane.xlu0 %463 }
 0x1db   : > { %v1609_v39 = vmax.f32 %v1595_v33, %v466_v37  ;;  %v1612_v40 = vmax.f32 %v1597_v34, %v464_v38 }
 0x1dd   : > { %773 = vst.msk [vmem:[#allocation2 + $0x68] sm:$0xff] %vm743_vm1, %v1609_v39  ;;  %587 = vperm.xlu1 %1178, %v1571_v23   ;;  %602 = vperm.xlu0 %1179, %v1609_v39   ;;  %772 = vst.msk [vmem:[#allocation2 + $0x60] sm:$0xff] %vm743_vm1, %v1612_v40 }
 0x1de   : > { %v454_v5 = vpop.xlane.xlu1 %453  ;;  %v452_v6 = vpop.xlane.xlu0 %451 }
 0x1df   : > { %v1629_v13 = vmax.f32 %v1614_v41, %v454_v5  ;;  %v1632_v14 = vmax.f32 %v1616_v58, %v452_v6 }
 0x1e1   : > { %767 = vst.msk [vmem:[#allocation2 + $0x38] sm:$0xff] %vm743_vm1, %v1629_v13  ;;  %562 = vperm.xlu1 %1178, %v1590_v31   ;;  %766 = vst.msk [vmem:[#allocation2 + $0x30] sm:$0xff] %vm743_vm1, %v1632_v14 }
 0x1e2   : > { %v470_v37 = vpop.xlane.xlu1 %469  ;;  %v468_v38 = vpop.xlane.xlu0 %467 }
 0x1e3   : > { %v1648_v5 = vmax.f32 %v1634_v21, %v470_v37  ;;  %v1651_v6 = vmax.f32 %v1636_v22, %v468_v38 }
 0x1e5   : > { %775 = vst.msk [vmem:[#allocation2 + $0x78] sm:$0xff] %vm743_vm1, %v1648_v5  ;;  %557 = vperm.xlu1 %1178, %v1593_v32   ;;  %612 = vperm.xlu0 %1179, %v1648_v5   ;;  %774 = vst.msk [vmem:[#allocation2 + $0x70] sm:$0xff] %vm743_vm1, %v1651_v6 }
 0x1e9   : > { %597 = vperm.xlu1 %1178, %v1612_v40  }
 0x1ed   : > { %572 = vperm.xlu1 %1178, %v1629_v13  }
 0x1f1   : > { %567 = vperm.xlu1 %1178, %v1632_v14  }
 0x1f5   : > { %607 = vperm.xlu1 %1178, %v1651_v6  }
 0x248   : > { %v543_v37 = vpop.permute.xlu1 %542  ;;  %v583_v38 = vpop.permute.xlu0 %582 }
 0x249   : > { %v616_v29 = vsub.f32 %v1459_v42, %v543_v37  ;;  %v624_v62 = vsub.f32 %v1461_v43, %v583_v38 }
 0x24b   : > { %v633_v61 = vmul.f32 1.442695, %v616_v29  ;;  %v649_v36 = vmul.f32 1.442695, %v624_v62 }
 0x24c   : > { %v538_v30 = vpop.permute.xlu0 %537 }
 0x24d   : > { %1180 = vpow2.f32 %v633_v61  ;;  %v615_v35 = vsub.f32 %v1465_v44, %v538_v30 }
 0x24e   : > { %1182 = vpow2.f32 %v649_v36 }
 0x24f   : > { %v631_v27 = vmul.f32 1.442695, %v615_v35 }
 0x250   : > { %v578_v28 = vpop.permute.xlu1 %577  ;;  %v593_v12 = vpop.permute.xlu0 %592 }
 0x251   : > { %1184 = vpow2.f32 %v631_v27  ;;  %v623_v20 = vsub.f32 %v1467_v45, %v578_v28  ;;  %v626_v11 = vsub.f32 %v1471_v47, %v593_v12 }
 0x253   : > { %v647_v19 = vmul.f32 1.442695, %v623_v20  ;;  %v653_v61 = vmul.f32 1.442695, %v626_v11 }
 0x254   : > { %v553_v3 = vpop.permute.xlu1 %552 }
 0x255   : > { %1186 = vpow2.f32 %v647_v19  ;;  %v618_v42 = vsub.f32 %v1469_v46, %v553_v3 }
 0x257   : > { %v1181_v43 = vpop.eup %1180  ;;  %v637_v62 = vmul.f32 1.442695, %v618_v42 }
 0x258   : > { %v1183_v29 = vpop.eup %1182  ;;  %v548_v37 = vpop.permute.xlu1 %547  ;;  %697 = vadd.xlane.f32.xlu0 %v1181_v43 }
 0x259   : > { %1188 = vpow2.f32 %v637_v62  ;;  %v617_v44 = vsub.f32 %v1475_v48, %v548_v37  ;;  %713 = vadd.xlane.f32.xlu1 %v1183_v29 }
 0x25a   : > { %1190 = vpow2.f32 %v653_v61 }
 0x25b   : > { %v1185_v27 = vpop.eup %1184  ;;  %v635_v45 = vmul.f32 1.442695, %v617_v44 }
 0x25c   : > { %v588_v20 = vpop.permute.xlu1 %587  ;;  %v603_v12 = vpop.permute.xlu0 %602 }
 0x25d   : > { %1192 = vpow2.f32 %v635_v45  ;;  %v625_v47 = vsub.f32 %v1477_v49, %v588_v20  ;;  %695 = vadd.xlane.f32.xlu1 %v1185_v27  ;;  %v628_v19 = vsub.f32 %v1481_v51, %v603_v12 }
 0x25f   : > { %v1187_v46 = vpop.eup %1186  ;;  %v651_v3 = vmul.f32 1.442695, %v625_v47  ;;  %v657_v36 = vmul.f32 1.442695, %v628_v19 }
 0x260   : > { %v563_v11 = vpop.permute.xlu1 %562  ;;  %711 = vadd.xlane.f32.xlu0 %v1187_v46 }
 0x261   : > { %1194 = vpow2.f32 %v651_v3  ;;  %v620_v28 = vsub.f32 %v1479_v50, %v563_v11 }
 0x263   : > { %v1189_v48 = vpop.eup %1188  ;;  %v641_v35 = vmul.f32 1.442695, %v620_v28 }
 0x264   : > { %v558_v30 = vpop.permute.xlu1 %557  ;;  %701 = vadd.xlane.f32.xlu1 %v1189_v48  ;;  %v1191_v49 = vpop.eup %1190 }
 0x265   : > { %1196 = vpow2.f32 %v641_v35  ;;  %v619_v38 = vsub.f32 %v1485_v52, %v558_v30  ;;  %v613_v51 = vpop.permute.xlu0 %612  ;;  %v1799_v30 = vsub.f32 %v1507_v59, %v1512_v63  ;;  %v1803_v63 = vsub.f32 %v1539_v10, %v1554_v16 }
 0x266   : > { %1198 = vpow2.f32 %v657_v36  ;;  %v630_v37 = vsub.f32 %v1491_v55, %v613_v51  ;;  %v505_v36 = vmul.f32 1.442695, %v488_v4  ;;  %v664_v4 = vld [vmem:[#allocation3 + $0x8] sm:$0xff] }
 0x267   : > { %v1193_v42 = vpop.eup %1192  ;;  %v639_v43 = vmul.f32 1.442695, %v619_v38  ;;  %v1800_v38 = vsub.f32 %v1517_v1, %v1532_v7  ;;  %v525_v51 = vmul.f32 1.442695, %v1803_v63  ;;  %v1804_v1 = vsub.f32 %v1558_v18, %v1574_v24  ;;  %v671_v24 = vld [vmem:[#allocation3 + $0x40] sm:$0xff] }
 0x268   : > { %v598_v62 = vpop.permute.xlu1 %597  ;;  %699 = vadd.xlane.f32.xlu0 %v1193_v42  ;;  %717 = vadd.xlane.f32.xlu1 %v1191_v49  ;;  %v661_v20 = vmul.f32 1.442695, %v630_v37  ;;  %v1801_v42 = vsub.f32 %v1537_v9, %v1551_v15  ;;  %v663_v37 = vld [vmem:[#allocation3] sm:$0xff] }
 0x269   : > { %1200 = vpow2.f32 %v639_v43  ;;  %v627_v29 = vsub.f32 %v1487_v53, %v598_v62  ;;  %v503_v49 = vmul.f32 1.442695, %v1800_v38  ;;  %v1802_v62 = vsub.f32 %v1519_v2, %v1535_v8  ;;  %v673_v38 = vld [vmem:[#allocation3 + $0x50] sm:$0xff] }
 0x26a   : > { %v519_v43 = vmul.f32 1.442695, %v1801_v42  ;;  %v507_v7 = vmul.f32 1.442695, %v1804_v1 }
 0x26b   : > { %v1195_v50 = vpop.eup %1194  ;;  %v655_v61 = vmul.f32 1.442695, %v627_v29  ;;  %v509_v60 = vmul.f32 1.442695, %v1802_v62  ;;  %v672_v29 = vld [vmem:[#allocation3 + $0x48] sm:$0xff] }
 0x26c   : > { %v573_v44 = vpop.permute.xlu1 %572  ;;  %715 = vadd.xlane.f32.xlu0 %v1195_v50 }
 0x26d   : > { %1202 = vpow2.f32 %v655_v61  ;;  %v622_v52 = vsub.f32 %v1489_v54, %v573_v44  ;;  %v1805_v44 = vsub.f32 %v1556_v17, %v1571_v23  ;;  %v666_v23 = vld [vmem:[#allocation3 + $0x18] sm:$0xff] }
 0x26f   : > { %v1197_v27 = vpop.eup %1196  ;;  %v645_v45 = vmul.f32 1.442695, %v622_v52  ;;  %v523_v52 = vmul.f32 1.442695, %v1805_v44 }
 0x270   : > { %v568_v47 = vpop.permute.xlu1 %567  ;;  %705 = vadd.xlane.f32.xlu1 %v1197_v27  ;;  %v1199_v46 = vpop.eup %1198 }
 0x271   : > { %1204 = vpow2.f32 %v645_v45  ;;  %v621_v12 = vsub.f32 %v1495_v56, %v568_v47  ;;  %v1806_v45 = vsub.f32 %v1576_v25, %v1590_v31 }
 0x272   : > { %1206 = vpow2.f32 %v661_v20 }
 0x273   : > { %v1201_v3 = vpop.eup %1200  ;;  %v643_v53 = vmul.f32 1.442695, %v621_v12  ;;  %v513_v20 = vmul.f32 1.442695, %v1806_v45 }
 0x274   : > { %703 = vadd.xlane.f32.xlu0 %v1201_v3  ;;  %v608_v19 = vpop.permute.xlu1 %607  ;;  %721 = vadd.xlane.f32.xlu1 %v1199_v46  ;;  %v1807_v3 = vsub.f32 %v1578_v26, %v1593_v32  ;;  %v1809_v26 = vsub.f32 %v1597_v34, %v1612_v40 }
 0x275   : > { %1208 = vpow2.f32 %v643_v53  ;;  %v629_v55 = vsub.f32 %v1497_v57, %v608_v19  ;;  %v521_v57 = vmul.f32 1.442695, %v1799_v30 }
 0x276   : > { %v511_v53 = vmul.f32 1.442695, %v1807_v3  ;;  %v527_v32 = vmul.f32 1.442695, %v1809_v26 }
 0x277   : > { %v1203_v11 = vpop.eup %1202  ;;  %v659_v54 = vmul.f32 1.442695, %v629_v55  ;;  %v1808_v55 = vsub.f32 %v1595_v33, %v1609_v39 }
 0x278   : > { %719 = vadd.xlane.f32.xlu0 %v1203_v11 }
 0x279   : > { %1210 = vpow2.f32 %v659_v54  ;;  %v529_v11 = vmul.f32 1.442695, %v1808_v55  ;;  %v677_v55 = vld [vmem:[#allocation3 + $0x70] sm:$0xff] }
 0x27a   : > { %1212 = vpow2.f32 %v505_v36 }
 0x27b   : > { %v1205_v28 = vpop.eup %1204  ;;  %1214 = vpow2.f32 %v521_v57 }
 0x27c   : > { %709 = vadd.xlane.f32.xlu1 %v1205_v28  ;;  %v1207_v48 = vpop.eup %1206  ;;  %1216 = vpow2.f32 %v503_v49 }
 0x27d   : > { %1218 = vpow2.f32 %v519_v43  ;;  %v1810_v43 = vsub.f32 %v1614_v41, %v1629_v13 }
 0x27e   : > { %1220 = vpow2.f32 %v509_v60 }
 0x27f   : > { %v1209_v35 = vpop.eup %1208  ;;  %1222 = vpow2.f32 %v525_v51  ;;  %v517_v62 = vmul.f32 1.442695, %v1810_v43  ;;  %v1812_v51 = vsub.f32 %v1634_v21, %v1648_v5 }
 0x280   : > { %707 = vadd.xlane.f32.xlu0 %v1209_v35  ;;  %725 = vadd.xlane.f32.xlu1 %v1207_v48  ;;  %1224 = vpow2.f32 %v507_v7  ;;  %v674_v48 = vld [vmem:[#allocation3 + $0x58] sm:$0xff]  ;;  %v665_v35 = vld [vmem:[#allocation3 + $0x10] sm:$0xff] }
 0x281   : > { %1226 = vpow2.f32 %v523_v52  ;;  %v533_v41 = vmul.f32 1.442695, %v1812_v51 }
 0x282   : > { %1228 = vpow2.f32 %v513_v20 }
 0x283   : > { %v1211_v56 = vpop.eup %1210  ;;  %1230 = vpow2.f32 %v511_v53 }
 0x284   : > { %723 = vadd.xlane.f32.xlu0 %v1211_v56  ;;  %v1213_v0 = vpop.eup %1212  ;;  %1232 = vpow2.f32 %v529_v11 }
 0x285   : > { %v1215_v59 = vpop.eup %1214  ;;  %v680_v9 = vmul.f32 %v1213_v0, %v664_v4  ;;  %1234 = vpow2.f32 %v527_v32  ;;  %v668_v0 = vld [vmem:[#allocation3 + $0x28] sm:$0xff]  ;;  %v1811_v4 = vsub.f32 %v1616_v58, %v1632_v14  ;;  %v1813_v58 = vsub.f32 %v1636_v22, %v1651_v6  ;;  %v670_v22 = vld [vmem:[#allocation3 + $0x38] sm:$0xff] }
 0x286   : > { %v688_v15 = vmul.f32 %v1215_v59, %v672_v29  ;;  %v1217_v61 = vpop.eup %1216  ;;  %1236 = vpow2.f32 %v517_v62 }
 0x287   : > { %v1219_v16 = vpop.eup %1218  ;;  %v679_v18 = vmul.f32 %v1217_v61, %v663_v37  ;;  %v515_v59 = vmul.f32 1.442695, %v1811_v4  ;;  %v531_v14 = vmul.f32 1.442695, %v1813_v58  ;;  %v675_v37 = vld [vmem:[#allocation3 + $0x60] sm:$0xff] }
 0x288   : > { %v687_v12 = vmul.f32 %v1219_v16, %v671_v24  ;;  %v1221_v46 = vpop.eup %1220 }
 0x289   : > { %v1223_v54 = vpop.eup %1222  ;;  %v682_v25 = vmul.f32 %v1221_v46, %v666_v23  ;;  %1238 = vpow2.f32 %v515_v59 }
 0x28a   : > { %v1225_v31 = vpop.eup %1224  ;;  %v690_v36 = vmul.f32 %v1223_v54, %v674_v48  ;;  %1240 = vpow2.f32 %v533_v41  ;;  %v783_v48 = vstv (!%p992_p8), %s782_s10 }
 0x28b   : > { %v681_v33 = vmul.f32 %v1225_v31, %v665_v35  ;;  %v1227_v39 = vpop.eup %1226  ;;  %1242 = vpow2.f32 %v531_v14  ;;  %v784_v35 = vmul.f32 (!%p992_p8), 1.442695, %v783_v48 }
 0x28c   : > { %v689_v34 = vmul.f32 %v1227_v39, %v673_v38  ;;  %v1229_v40 = vpop.eup %1228 }
 0x28d   : > { %v1231_v13 = vpop.eup %1230  ;;  %v684_v29 = vmul.f32 %v1229_v40, %v668_v0  ;;  %1244 = vpow2.f32 (!%p992_p8), %v784_v35  ;;  %v800_v35 = vld [vmem:[#allocation2 + $0x68] sm:$0xff] (!%p992_p8) }
 0x28e   : > { %v1233_v1 = vpop.eup %1232 }
 0x28f   : > { %v1235_v5 = vpop.eup %1234 }
 0x290   : > { %v1237_v16 = vpop.eup %1236 }
 0x293   : > { %v1239_v24 = vpop.eup %1238 }
 0x294   : > { %v1241_v45 = vpop.eup %1240 }
 0x295   : > { %v1243_v3 = vpop.eup %1242 }
 0x2e5   : > { %v698_v50 = vpop.xlane.xlu0 %697 }
 0x2e6   : > { %v714_v2 = vpop.xlane.xlu1 %713  ;;  %v728_v8 = vadd.f32 %v698_v50, %v680_v9  ;;  %v676_v9 = vld [vmem:[#allocation3 + $0x68] sm:$0xff] }
 0x2e7   : > { %v736_v10 = vadd.f32 %v714_v2, %v688_v15  ;;  %v667_v15 = vld [vmem:[#allocation3 + $0x20] sm:$0xff]  ;;  %v692_v61 = vmul.f32 %v1233_v1, %v676_v9 }
 0x2e8   : > { %745 = vst.msk [vmem:[#allocation3 + $0x8] sm:$0xff] %vm743_vm1, %v728_v8  ;;  %v683_v21 = vmul.f32 %v1231_v13, %v667_v15 }
 0x2e9   : > { %753 = vst.msk [vmem:[#allocation3 + $0x48] sm:$0xff] %vm743_vm1, %v736_v10  ;;  %v691_v10 = vmul.f32 %v1235_v5, %v675_v37  ;;  %v790_v37 = vld [vmem:[#allocation2 + $0x18] sm:$0xff] (!%p992_p8) }
 0x2ea   : > { %v696_v27 = vpop.xlane.xlu1 %695 }
 0x2eb   : > { %v727_v47 = vadd.f32 %v696_v27, %v679_v18  ;;  %v686_v27 = vmul.f32 %v1237_v16, %v670_v22  ;;  %v792_v22 = vld [vmem:[#allocation2 + $0x28] sm:$0xff] (!%p992_p8) }
 0x2ed   : > { %744 = vst.msk [vmem:[#allocation3] sm:$0xff] %vm743_vm1, %v727_v47  ;;  %v712_v17 = vpop.xlane.xlu0 %711  ;;  %v678_v47 = vld [vmem:[#allocation3 + $0x78] sm:$0xff] }
 0x2ee   : > { %v735_v19 = vadd.f32 %v712_v17, %v687_v12  ;;  %v669_v12 = vld [vmem:[#allocation3 + $0x30] sm:$0xff]  ;;  %v694_v17 = vmul.f32 %v1241_v45, %v678_v47 }
 0x2ef   : > { %v685_v23 = vmul.f32 %v1239_v24, %v669_v12  ;;  %v804_v32 = vld [vmem:[#allocation3 + $0x8] sm:$0xff] (!%p992_p8)  ;;  %v794_v24 = vld [vmem:[#allocation2 + $0x38] sm:$0xff] (!%p992_p8) }
 0x2f0   : > { %752 = vst.msk [vmem:[#allocation3 + $0x40] sm:$0xff] %vm743_vm1, %v735_v19  ;;  %v796_v12 = vld [vmem:[#allocation2 + $0x48] sm:$0xff] (!%p992_p8) }
 0x2f1   : > { %v702_v28 = vpop.xlane.xlu1 %701 }
 0x2f2   : > { %v730_v56 = vadd.f32 %v702_v28, %v682_v25  ;;  %v693_v25 = vmul.f32 %v1243_v3, %v677_v55 }
 0x2f4   : > { %747 = vst.msk [vmem:[#allocation3 + $0x18] sm:$0xff] %vm743_vm1, %v730_v56  ;;  %v1245_v56 = vpop.eup (!%p992_p8), %1244  ;;  %v803_v26 = vld [vmem:[#allocation3] sm:$0xff] (!%p992_p8) }
 0x2f5   : > { %v718_v30 = vpop.xlane.xlu1 %717  ;;  %v700_v57 = vpop.xlane.xlu0 %699  ;;  %1131 = vpush (!%p992_p8), %v1245_v56  ;;  %1246 = vlog2.f32 (!%p992_p8), %v803_v26  ;;  %v801_v56 = vld [vmem:[#allocation2 + $0x70] sm:$0xff] (!%p992_p8)  ;;  %v802_v26 = vld [vmem:[#allocation2 + $0x78] sm:$0xff] (!%p992_p8) }
 0x2f6   : > { %v738_v49 = vadd.f32 %v718_v30, %v690_v36  ;;  %v729_v42 = vadd.f32 %v700_v57, %v681_v33  ;;  %1248 = vlog2.f32 (!%p992_p8), %v804_v32 }
 0x2f8   : > { %755 = vst.msk [vmem:[#allocation3 + $0x58] sm:$0xff] %vm743_vm1, %v738_v49  ;;  %746 = vst.msk [vmem:[#allocation3 + $0x10] sm:$0xff] %vm743_vm1, %v729_v42  ;;  %v811_v49 = vld [vmem:[#allocation3 + $0x40] sm:$0xff] (!%p992_p8)  ;;  %v812_v42 = vld [vmem:[#allocation3 + $0x48] sm:$0xff] (!%p992_p8) }
 0x2f9   : > { %v716_v60 = vpop.xlane.xlu0 %715 }
 0x2fa   : > { %v737_v63 = vadd.f32 %v716_v60, %v689_v34 }
 0x2fb   : > { %v806_v33 = vld [vmem:[#allocation3 + $0x18] sm:$0xff] (!%p992_p8) }
 0x2fc   : > { %754 = vst.msk [vmem:[#allocation3 + $0x50] sm:$0xff] %vm743_vm1, %v737_v63 }
 0x2fd   : > { %v706_v7 = vpop.xlane.xlu1 %705 }
 0x2fe   : > { %v732_v50 = vadd.f32 %v706_v7, %v684_v29 }
 0x2ff   : > { %v805_v36 = vld [vmem:[#allocation3 + $0x10] sm:$0xff] (!%p992_p8)  ;;  %v814_v62 = vld [vmem:[#allocation3 + $0x58] sm:$0xff] (!%p992_p8)  ;;  %v1247_v40 = vpop.eup (!%p992_p8), %1246 }
 0x300   : > { %749 = vst.msk [vmem:[#allocation3 + $0x28] sm:$0xff] %vm743_vm1, %v732_v50  ;;  %1250 = vlog2.f32 (!%p992_p8), %v805_v36  ;;  %v1249_v0 = vpop.eup (!%p992_p8), %1248 }
 0x301   : > { %v722_v2 = vpop.xlane.xlu1 %721  ;;  %v704_v8 = vpop.xlane.xlu0 %703  ;;  %1252 = vlog2.f32 (!%p992_p8), %v806_v33 }
 0x302   : > { %v740_v44 = vadd.f32 %v722_v2, %v692_v61  ;;  %v731_v52 = vadd.f32 %v704_v8, %v683_v21  ;;  %v787_v61 = vld [vmem:[#allocation2] sm:$0xff] (!%p992_p8)  ;;  %v820_v21 = vmul.f32 (!%p992_p8), 0.6931472, %v1247_v40  ;;  %v788_v2 = vld [vmem:[#allocation2 + $0x8] sm:$0xff] (!%p992_p8)  ;;  %v789_v8 = vld [vmem:[#allocation2 + $0x10] sm:$0xff] (!%p992_p8) }
 0x303   : > { %v813_v43 = vld [vmem:[#allocation3 + $0x50] sm:$0xff] (!%p992_p8) }
 0x304   : > { %757 = vst.msk [vmem:[#allocation3 + $0x68] sm:$0xff] %vm743_vm1, %v740_v44  ;;  %748 = vst.msk [vmem:[#allocation3 + $0x20] sm:$0xff] %vm743_vm1, %v731_v52  ;;  %v791_v44 = vld [vmem:[#allocation2 + $0x20] sm:$0xff] (!%p992_p8)  ;;  %v822_v52 = vmul.f32 (!%p992_p8), 0.6931472, %v1249_v0  ;;  %v851_v48 = vadd.f32 (!%p992_p8), %v820_v21, %v787_v61 }
 0x305   : > { %v720_v18 = vpop.xlane.xlu0 %719 }
 0x306   : > { %v739_v6 = vadd.f32 %v720_v18, %v691_v10  ;;  %v852_v32 = vadd.f32 (!%p992_p8), %v822_v52, %v788_v2 }
 0x307   : > { %v808_v30 = vld [vmem:[#allocation3 + $0x28] sm:$0xff] (!%p992_p8) }
 0x308   : > { %756 = vst.msk [vmem:[#allocation3 + $0x60] sm:$0xff] %vm743_vm1, %v739_v6  ;;  %v793_v6 = vld [vmem:[#allocation2 + $0x30] sm:$0xff] (!%p992_p8) }
 0x309   : > { %v710_v20 = vpop.xlane.xlu1 %709 }
 0x30a   : > { %v734_v46 = vadd.f32 %v710_v20, %v686_v27  ;;  %v1251_v59 = vpop.eup (!%p992_p8), %1250  ;;  %v795_v27 = vld [vmem:[#allocation2 + $0x40] sm:$0xff] (!%p992_p8) }
 0x30b   : > { %v807_v39 = vld [vmem:[#allocation3 + $0x20] sm:$0xff] (!%p992_p8)  ;;  %v816_v60 = vld [vmem:[#allocation3 + $0x68] sm:$0xff] (!%p992_p8)  ;;  %v1253_v51 = vpop.eup (!%p992_p8), %1252  ;;  %v824_v10 = vmul.f32 (!%p992_p8), 0.6931472, %v1251_v59 }
 0x30c   : > { %751 = vst.msk [vmem:[#allocation3 + $0x38] sm:$0xff] %vm743_vm1, %v734_v46  ;;  %1254 = vlog2.f32 (!%p992_p8), %v807_v39  ;;  %v826_v16 = vmul.f32 (!%p992_p8), 0.6931472, %v1253_v51  ;;  %v797_v46 = vld [vmem:[#allocation2 + $0x50] sm:$0xff] (!%p992_p8) }
 0x30d   : > { %v726_v53 = vpop.xlane.xlu1 %725  ;;  %v708_v19 = vpop.xlane.xlu0 %707  ;;  %1256 = vlog2.f32 (!%p992_p8), %v808_v30  ;;  %v853_v36 = vadd.f32 (!%p992_p8), %v824_v10, %v789_v8 }
 0x30e   : > { %v742_v11 = vadd.f32 %v726_v53, %v694_v17  ;;  %v733_v54 = vadd.f32 %v708_v19, %v685_v23  ;;  %779 = sbr.rel (%p992_p8) target bundleno = 819 (0x333), region = 40  ;;  %v798_v17 = vld [vmem:[#allocation2 + $0x58] sm:$0xff] (!%p992_p8)  ;;  %v799_v23 = vld [vmem:[#allocation2 + $0x60] sm:$0xff] (!%p992_p8)  ;;  %v854_v33 = vadd.f32 (!%p992_p8), %v826_v16, %v790_v37 }
 0x30f   : > { %v815_v34 = vld [vmem:[#allocation3 + $0x60] sm:$0xff] (!%p992_p8) }
 0x310   : > { %759 = vst.msk [vmem:[#allocation3 + $0x78] sm:$0xff] %vm743_vm1, %v742_v11  ;;  %750 = vst.msk [vmem:[#allocation3 + $0x30] sm:$0xff] %vm743_vm1, %v733_v54 }
 0x311   : > { %v724_v31 = vpop.xlane.xlu0 %723 }
 0x312   : > { %v741_v28 = vadd.f32 %v724_v31, %v693_v25 }
 0x313   : > { %v810_v38 = vld [vmem:[#allocation3 + $0x38] sm:$0xff] (!%p992_p8) }
 0x314   : > { %758 = vst.msk [vmem:[#allocation3 + $0x70] sm:$0xff] %vm743_vm1, %v741_v28 }
 0x316   : > { %v1255_v41 = vpop.eup %1254 }
 0x317   : > { %v809_v57 = vld [vmem:[#allocation3 + $0x30] sm:$0xff]  ;;  %v818_v63 = vld [vmem:[#allocation3 + $0x78] sm:$0xff]  ;;  %v1257_v13 = vpop.eup %1256  ;;  %v828_v45 = vmul.f32 0.6931472, %v1255_v41 }
 0x318   : > { %1258 = vlog2.f32 %v809_v57  ;;  %v830_v20 = vmul.f32 0.6931472, %v1257_v13 }
 0x319   : > { %1260 = vlog2.f32 %v810_v38  ;;  %v855_v39 = vadd.f32 %v828_v45, %v791_v44 }
 0x31a   : > { %1262 = vlog2.f32 %v811_v49  ;;  %v856_v30 = vadd.f32 %v830_v20, %v792_v22 }
 0x31b   : > { %1264 = vlog2.f32 %v812_v42  ;;  %v817_v4 = vld [vmem:[#allocation3 + $0x70] sm:$0xff] }
 0x31c   : > { %1266 = vlog2.f32 %v813_v43 }
 0x31d   : > { %1268 = vlog2.f32 %v814_v62 }
 0x31e   : > { %1270 = vlog2.f32 %v815_v34 }
 0x31f   : > { %1272 = vlog2.f32 %v816_v60 }
 0x320   : > { %1274 = vlog2.f32 %v817_v4 }
 0x321   : > { %1276 = vlog2.f32 %v818_v63 }
 0x322   : > { %v1259_v29 = vpop.eup %1258 }
 0x323   : > { %v1261_v1 = vpop.eup %1260  ;;  %v832_v47 = vmul.f32 0.6931472, %v1259_v29 }
 0x324   : > { %v1263_v7 = vpop.eup %1262  ;;  %v834_v3 = vmul.f32 0.6931472, %v1261_v1 }
 0x325   : > { %v1265_v9 = vpop.eup %1264  ;;  %v836_v53 = vmul.f32 0.6931472, %v1263_v7  ;;  %v857_v57 = vadd.f32 %v832_v47, %v793_v6 }
 0x326   : > { %v1267_v15 = vpop.eup %1266  ;;  %v838_v19 = vmul.f32 0.6931472, %v1265_v9  ;;  %v858_v38 = vadd.f32 %v834_v3, %v794_v24  ;;  %s1132_s11 = spop %1131 }
 0x327   : > { %v1269_v50 = vpop.eup %1268  ;;  %v840_v55 = vmul.f32 0.6931472, %v1267_v15  ;;  %v859_v49 = vadd.f32 %v836_v53, %v795_v27  ;;  %v867_v4 = vstv %s1132_s11 }
 0x328   : > { %v1271_v58 = vpop.eup %1270  ;;  %v842_v11 = vmul.f32 0.6931472, %v1269_v50  ;;  %v860_v42 = vadd.f32 %v838_v19, %v796_v12  ;;  %v868_v59 = vsub.f32 %v851_v48, %v867_v4  ;;  %v869_v63 = vsub.f32 %v852_v32, %v867_v4 }
 0x329   : > { %v1273_v14 = vpop.eup %1272  ;;  %v844_v54 = vmul.f32 0.6931472, %v1271_v58  ;;  %v861_v43 = vadd.f32 %v840_v55, %v797_v46  ;;  %v870_v51 = vsub.f32 %v853_v36, %v867_v4  ;;  %v871_v41 = vsub.f32 %v854_v33, %v867_v4 }
 0x32a   : > { %v1275_v5 = vpop.eup %1274  ;;  %v846_v25 = vmul.f32 0.6931472, %v1273_v14  ;;  %v862_v62 = vadd.f32 %v842_v11, %v798_v17  ;;  %v872_v13 = vsub.f32 %v855_v39, %v867_v4  ;;  %v873_v29 = vsub.f32 %v856_v30, %v867_v4  ;;  %884 = vst.msk [vmem:[%s1392_s5] sm:$0xff] %vm743_vm1, %v868_v59  ;;  %885 = vst.msk [vmem:[%s1392_s5 + $0x8] sm:$0xff] %vm743_vm1, %v869_v63 }
 0x32b   : > { %v1277_v18 = vpop.eup %1276  ;;  %v848_v31 = vmul.f32 0.6931472, %v1275_v5  ;;  %v863_v34 = vadd.f32 %v844_v54, %v799_v23  ;;  %v874_v1 = vsub.f32 %v857_v57, %v867_v4  ;;  %v875_v7 = vsub.f32 %v858_v38, %v867_v4  ;;  %886 = vst.msk [vmem:[%s1392_s5 + $0x10] sm:$0xff] %vm743_vm1, %v870_v51  ;;  %887 = vst.msk [vmem:[%s1392_s5 + $0x18] sm:$0xff] %vm743_vm1, %v871_v41 }
 0x32c   : > { %v850_v28 = vmul.f32 0.6931472, %v1277_v18  ;;  %v864_v40 = vadd.f32 %v846_v25, %v800_v35  ;;  %v876_v9 = vsub.f32 %v859_v49, %v867_v4  ;;  %v877_v15 = vsub.f32 %v860_v42, %v867_v4  ;;  %888 = vst.msk [vmem:[%s1392_s5 + $0x20] sm:$0xff] %vm743_vm1, %v872_v13  ;;  %889 = vst.msk [vmem:[%s1392_s5 + $0x28] sm:$0xff] %vm743_vm1, %v873_v29 }
 0x32d   : > { %v865_v60 = vadd.f32 %v848_v31, %v801_v56  ;;  %v878_v50 = vsub.f32 %v861_v43, %v867_v4  ;;  %v879_v58 = vsub.f32 %v862_v62, %v867_v4  ;;  %v880_v14 = vsub.f32 %v863_v34, %v867_v4  ;;  %890 = vst.msk [vmem:[%s1392_s5 + $0x30] sm:$0xff] %vm743_vm1, %v874_v1 }
 0x32e   : > { %v866_v0 = vadd.f32 %v850_v28, %v802_v26  ;;  %v881_v61 = vsub.f32 %v864_v40, %v867_v4  ;;  %891 = vst.msk [vmem:[%s1392_s5 + $0x38] sm:$0xff] %vm743_vm1, %v875_v7  ;;  %892 = vst.msk [vmem:[%s1392_s5 + $0x40] sm:$0xff] %vm743_vm1, %v876_v9 }
 0x32f   : > { %v882_v21 = vsub.f32 %v865_v60, %v867_v4  ;;  %893 = vst.msk [vmem:[%s1392_s5 + $0x48] sm:$0xff] %vm743_vm1, %v877_v15  ;;  %894 = vst.msk [vmem:[%s1392_s5 + $0x50] sm:$0xff] %vm743_vm1, %v878_v50 }
 0x330   : > { %v883_v5 = vsub.f32 %v866_v0, %v867_v4  ;;  %895 = vst.msk [vmem:[%s1392_s5 + $0x58] sm:$0xff] %vm743_vm1, %v879_v58  ;;  %896 = vst.msk [vmem:[%s1392_s5 + $0x60] sm:$0xff] %vm743_vm1, %v880_v14 }
 0x331   : > { %897 = vst.msk [vmem:[%s1392_s5 + $0x68] sm:$0xff] %vm743_vm1, %v881_v61  ;;  %898 = vst.msk [vmem:[%s1392_s5 + $0x70] sm:$0xff] %vm743_vm1, %v882_v21 }
 0x332   : > { %899 = vst.msk [vmem:[%s1392_s5 + $0x78] sm:$0xff] %vm743_vm1, %v883_v5 }
 0x333 PF: > { %s14_s18 = sadd.s32 1, %s1316_s18   ;;  %s1814_s14 = smov %s1308_s16 }
 0x334   : > { %p11_p9 = scmp.ge.s32.totalorder %s14_s18, 6   ;;  %s1815_s15 = smov %s1312_s17 }
 0x335   : > { %s1816_s16 = smov %s1819_s0  ;;  %s1817_s17 = smov %s1823_s19 }
 0x336   :  { %13 = sbr.rel (!%p11_p9) target bundleno = 3 (0x3), region = 73 }

</bundles_post_ra>
